<compile_context>
chip_gen: v7x
topology: tpu7x:2x2x1
jax: 0.10.0
libtpu: 0.0.40
codegen_flags: <defaults>
</compile_context>

<pallas_src>
import jax
import jax.numpy as jnp
from jax.experimental import pallas as pl
from jax.experimental.pallas import tpu as pltpu

LANE = 128
_NEG_INF = -1e30


def _round_up(x, m):
    return (x + m - 1) // m * m


def _make_sanet_kernel(need_mask):
    def body(c_ref, csc_ref, csh_ref, gkt_ref, hv_ref, mask_ref,
             wf_ref, bf_ref, wo_ref, bo_ref, out_ref,
             fq_sc, m_sc, l_sc, acc_sc):
        k = pl.program_id(2)

        # ---- per-(batch, query-tile) init: first key tile only ----
        @pl.when(k == 0)
        def _init():
            c = c_ref[0]                                    # (TQ, Cp) f32
            cn = c * csc_ref[0] + csh_ref[0]                # folded mean/var norm
            fq = jnp.dot(cn.astype(jnp.bfloat16), wf_ref[...],
                         preferred_element_type=jnp.float32) + bf_ref[...]
            fq_sc[...] = fq.astype(fq_sc.dtype)             # bf16 query block
            m_sc[...] = jnp.full_like(m_sc, _NEG_INF)
            l_sc[...] = jnp.zeros_like(l_sc)
            acc_sc[...] = jnp.zeros_like(acc_sc)

        # ---- per key tile: online-softmax attention step (G/H convs hoisted) ----
        # scores (TQ, TK): fq (TQ,Cp) @ GkT (Cp,TK) -> no in-kernel transpose
        s_blk = jnp.dot(fq_sc[...], gkt_ref[0],
                        preferred_element_type=jnp.float32)
        if need_mask:                                       # static decision
            s_blk = s_blk + mask_ref[...]                   # (1, TK) additive mask

        m_prev = m_sc[...]
        m_new = jnp.maximum(m_prev, jnp.max(s_blk, axis=-1, keepdims=True))
        alpha = jnp.exp(m_prev - m_new)
        p = jnp.exp(s_blk - m_new)
        l_sc[...] = alpha * l_sc[...] + jnp.sum(p, axis=-1, keepdims=True)
        acc_sc[...] = alpha * acc_sc[...] + jnp.dot(
            p.astype(jnp.bfloat16), hv_ref[0],
            preferred_element_type=jnp.float32)
        m_sc[...] = m_new

        # ---- finalize at the last key tile: scale, out_conv, residual ----
        @pl.when(k == pl.num_programs(2) - 1)
        def _finalize():
            o = acc_sc[...] * pl.reciprocal(l_sc[...], approx=True)
            out = (jnp.dot(o.astype(jnp.bfloat16), wo_ref[...],
                           preferred_element_type=jnp.float32)
                   + bo_ref[...] + c_ref[0])
            out_ref[0] = out.astype(out_ref.dtype)

    if need_mask:
        def kernel(c_ref, csc_ref, csh_ref, gkt_ref, hv_ref, mask_ref,
                   wf_ref, bf_ref, wo_ref, bo_ref, out_ref,
                   fq_sc, m_sc, l_sc, acc_sc):
            body(c_ref, csc_ref, csh_ref, gkt_ref, hv_ref, mask_ref,
                 wf_ref, bf_ref, wo_ref, bo_ref, out_ref,
                 fq_sc, m_sc, l_sc, acc_sc)
        return kernel

    def kernel(c_ref, csc_ref, csh_ref, gkt_ref, hv_ref,
               wf_ref, bf_ref, wo_ref, bo_ref, out_ref,
               fq_sc, m_sc, l_sc, acc_sc):
        body(c_ref, csc_ref, csh_ref, gkt_ref, hv_ref, None,
             wf_ref, bf_ref, wo_ref, bo_ref, out_ref,
             fq_sc, m_sc, l_sc, acc_sc)
    return kernel


def sanet_forward(content_nchw, style_nchw, params, *, tq=512, tk=512, eps=1e-5):
    """content/style: (B, C, H, W) float32.  Returns (B, C, H, W) float32."""
    B, C, Hc, Wc = content_nchw.shape
    Bs, Cs, Hs, Ws = style_nchw.shape
    assert B == Bs and C == Cs
    HWc, HWs = Hc * Wc, Hs * Ws
    f32, bf16 = jnp.float32, jnp.bfloat16

    # NCHW -> (B, HW, C) channels-last (row-major over (h, w), matches .view(b,c,h*w))
    content_cl = jnp.transpose(content_nchw, (0, 2, 3, 1)).reshape(B, HWc, C).astype(f32)
    style_cl = jnp.transpose(style_nchw, (0, 2, 3, 1)).reshape(B, HWs, C).astype(f32)

    # global per-channel mean_variance_norm statistics folded into scale/shift
    def _stats(x):
        mean = jnp.mean(x, axis=1, keepdims=True)
        var = jnp.var(x, axis=1, keepdims=True, ddof=1)     # torch.var default: unbiased
        inv_std = 1.0 / jnp.sqrt(var + eps)
        return inv_std, -mean * inv_std

    scale_c, shift_c = _stats(content_cl)                   # (B, 1, C)
    scale_s, shift_s = _stats(style_cl)

    # ---- tile sizes: lane-dense channels, MXU-aligned spatial tiles ----
    Cp = _round_up(C, LANE)
    TQ = min(_round_up(tq, LANE), _round_up(HWc, LANE))
    TK = min(_round_up(tk, LANE), _round_up(HWs, LANE))
    if B == 1 and HWc > LANE:
        # keep >= 2 query tiles so both v7x TensorCores get work when B == 1
        TQ = min(TQ, _round_up(-(-HWc // 2), LANE))

    # clamp the VMEM footprint to the chip (v7x: 64 MiB; v5e/v6e: 128 MiB)
    try:
        vmem_cap = int(pltpu.get_tpu_info().vmem_capacity_bytes)
    except Exception:
        vmem_cap = 64 * 1024 * 1024
    budget = int(0.75 * vmem_cap)

    def _vmem_est(tq_, tk_):
        n = 0
        n += 2 * 2 * tq_ * Cp * 4            # content in + out tiles (f32, double-buffered)
        n += 2 * Cp * tk_ * 2                # GkT key tile (bf16, double-buffered)
        n += 2 * tk_ * Cp * 2                # Hv key tile (bf16, double-buffered)
        n += 2 * tk_ * 4                     # key-padding mask tile
        n += 2 * 2 * Cp * 4                  # content scale/shift
        n += 2 * Cp * Cp * 2                 # Wf + Wo (bf16, single-buffered)
        n += 2 * Cp * 4                      # bf + bo
        n += tq_ * Cp * 2 + tq_ * Cp * 4     # Fq (bf16) + acc (f32) scratch
        n += 2 * tq_ * LANE * 4              # running max / sum scratch (lane-padded)
        return n

    while _vmem_est(TQ, TK) > budget and (TQ > LANE or TK > LANE):
        if TQ >= TK and TQ > LANE:
            TQ = _round_up(TQ // 2, LANE)
        else:
            TK = _round_up(TK // 2, LANE)

    QT = -(-HWc // TQ)
    KT = -(-HWs // TK)
    HWc_p, HWs_p = QT * TQ, KT * TK
    need_mask = (HWs_p != HWs)
    vmem_limit = min(max(32 * 1024 * 1024, 2 * _vmem_est(TQ, TK)), budget)

    # ---- host-side prep: padding, hoisted G/H convs, bf16 weights ----
    def _pad3(x, rows, cols):
        return jnp.pad(x, ((0, 0), (0, rows - x.shape[1]), (0, cols - x.shape[2])))

    content_p = _pad3(content_cl, HWc_p, Cp)
    scale_c_p = _pad3(scale_c, 1, Cp)
    shift_c_p = _pad3(shift_c, 1, Cp)

    def _w(name):
        return jnp.asarray(params[name], f32)

    def _bias(name):
        return jnp.asarray(params[name], f32).reshape(1, 1, C)

    # hoisted 1x1 convs (once per batch, plain XLA), stored bf16 in HBM.
    # G is pre-transposed to (B, Cp, HWs_p) so the score matmul contracts directly.
    style_n = style_cl * scale_s + shift_s
    gk = jnp.einsum("bkc,oc->bko", style_n, _w("wg")) + _bias("bg")     # (B, HWs, C)
    hv = jnp.einsum("bkc,oc->bko", style_cl, _w("wh")) + _bias("bh")
    gkt_p = jnp.pad(jnp.transpose(gk, (0, 2, 1)),
                    ((0, 0), (0, Cp - C), (0, HWs_p - HWs))).astype(bf16)
    hv_p = _pad3(hv, HWs_p, Cp).astype(bf16)

    # f / out_conv weights: (out,in) -> (in,out), zero-pad to (Cp,Cp), bf16
    def _prep_w(name):
        wt = jnp.asarray(params[name], f32).T
        return jnp.pad(wt, ((0, Cp - C), (0, Cp - C))).astype(bf16)

    def _prep_b(name):
        return jnp.pad(jnp.asarray(params[name], f32).reshape(1, C),
                       ((0, 0), (0, Cp - C)))

    wf, bf = _prep_w("wf"), _prep_b("bf")
    wo, bo = _prep_w("wo"), _prep_b("bo")

    operands = [content_p, scale_c_p, shift_c_p, gkt_p, hv_p]
    in_specs = [
        pl.BlockSpec((1, TQ, Cp), lambda b, q, k: (b, q, 0)),        # content tile
        pl.BlockSpec((1, 1, Cp), lambda b, q, k: (b, 0, 0)),         # content scale
        pl.BlockSpec((1, 1, Cp), lambda b, q, k: (b, 0, 0)),         # content shift
        pl.BlockSpec((1, Cp, TK), lambda b, q, k: (b, 0, k)),        # GkT key tile
        pl.BlockSpec((1, TK, Cp), lambda b, q, k: (b, k, 0)),        # Hv key tile
    ]
    if need_mask:
        key_pos = jnp.arange(HWs_p)
        mask = jnp.where(key_pos < HWs, 0.0, _NEG_INF).astype(f32).reshape(1, HWs_p)
        operands.append(mask)
        in_specs.append(pl.BlockSpec((1, TK), lambda b, q, k: (0, k)))

    # constant-index operands: single-buffer (no pointless double-buffering)
    buf1 = {"pipeline_mode": pl.Buffered(1)} if hasattr(pl, "Buffered") else {}
    w_spec = pl.BlockSpec((Cp, Cp), lambda b, q, k: (0, 0), **buf1)
    b_spec = pl.BlockSpec((1, Cp), lambda b, q, k: (0, 0), **buf1)
    operands += [wf, bf, wo, bo]
    in_specs += [w_spec, b_spec, w_spec, b_spec]

    out_p = pl.pallas_call(
        _make_sanet_kernel(need_mask),
        out_shape=jax.ShapeDtypeStruct((B, HWc_p, Cp), f32),
        grid_spec=pltpu.PrefetchScalarGridSpec(
            num_scalar_prefetch=0,
            grid=(B, QT, KT),
            in_specs=in_specs,
            out_specs=pl.BlockSpec((1, TQ, Cp), lambda b, q, k: (b, q, 0)),
            scratch_shapes=[
                pltpu.VMEM((TQ, Cp), bf16),     # Fq (resident per query tile)
                pltpu.VMEM((TQ, 1), f32),       # running max
                pltpu.VMEM((TQ, 1), f32),       # running sum
                pltpu.VMEM((TQ, Cp), f32),      # unnormalized O accumulator
            ],
        ),
        compiler_params=pltpu.CompilerParams(
            dimension_semantics=("parallel", "parallel", "arbitrary"),
            vmem_limit_bytes=vmem_limit),
    )(*operands)

    out = out_p[:, :HWc, :C].reshape(B, Hc, Wc, C)
    return jnp.transpose(out, (0, 3, 1, 2))


def make_params(key, in_planes):
    """Deterministic synthetic parameters for the four 1x1 convs.
    Conv2d weight (out, in, 1, 1) stored squeezed to (out, in); bias as (1, out)."""
    ks = jax.random.split(key, 8)
    scale = 1.0 / jnp.sqrt(in_planes)

    def w(k):
        return (jax.random.uniform(k, (in_planes, in_planes), jnp.float32,
                                   minval=-1.0, maxval=1.0) * scale)

    def b(k):
        return (jax.random.uniform(k, (1, in_planes), jnp.float32,
                                   minval=-1.0, maxval=1.0) * scale)

    return {
        "wf": w(ks[0]), "bf": b(ks[1]),
        "wg": w(ks[2]), "bg": b(ks[3]),
        "wh": w(ks[4]), "bh": b(ks[5]),
        "wo": w(ks[6]), "bo": b(ks[7]),
    }


def sanet_reference(content, style, params, eps=1e-5):
    """Pure-JAX port of the PyTorch SANet.forward (f32 throughout)."""
    B, C, Hc, Wc = content.shape
    _, _, Hs, Ws = style.shape

    def mvn(x):
        flat = x.reshape(B, C, -1)
        mean = flat.mean(axis=2).reshape(B, C, 1, 1)
        var = jnp.var(flat, axis=2, ddof=1).reshape(B, C, 1, 1)
        return (x - mean) / jnp.sqrt(var + eps)

    def conv1x1(x, w, b):
        return jnp.einsum("oc,bchw->bohw", w, x) + b.reshape(1, C, 1, 1)

    F = conv1x1(mvn(content), params["wf"], params["bf"])
    G = conv1x1(mvn(style), params["wg"], params["bg"])
    Hh = conv1x1(style, params["wh"], params["bh"])
    Fm = jnp.transpose(F.reshape(B, C, Hc * Wc), (0, 2, 1))     # (B, HWc, C)
    Gm = G.reshape(B, C, Hs * Ws)                               # (B, C, HWs)
    S = jax.nn.softmax(jnp.einsum("bqc,bck->bqk", Fm, Gm), axis=-1)
    Hm = Hh.reshape(B, C, Hs * Ws)
    O = jnp.einsum("bck,bqk->bcq", Hm, S).reshape(B, C, Hc, Wc)
    return conv1x1(O, params["wo"], params["bo"]) + content


if __name__ == "__main__":
    key = jax.random.PRNGKey(0)
    k_c, k_s, k_p = jax.random.split(key, 3)

    # in_planes = 32; H=W=12 -> HW=144 exercises query padding + key-padding mask
    B, C, H, W = 2, 32, 12, 12
    content = jax.random.normal(k_c, (B, C, H, W), jnp.float32)
    style = jax.random.normal(k_s, (B, C, H, W), jnp.float32)
    params = make_params(k_p, C)

    ref = jax.block_until_ready(sanet_reference(content, style, params))

    # multi-tile online-softmax path (QT = KT = 2) with padded-key mask
    out_small = jax.block_until_ready(
        sanet_forward(content, style, params, tq=128, tk=128))
    assert out_small.shape == (B, C, H, W) and out_small.dtype == jnp.float32
    err = float(jnp.max(jnp.abs(out_small - ref)))
    assert err < 0.25, f"tiled path: max abs diff vs reference too large: {err}"

    # default (large-tile) path: single key tile per query tile
    out_big = jax.block_until_ready(sanet_forward(content, style, params))
    err = float(jnp.max(jnp.abs(out_big - ref)))
    assert err < 0.25, f"default path: max abs diff vs reference too large: {err}"

    print("KERNEL_OK")
</pallas_src>

<mosaic_0001>
module attributes {stable_mosaic.version = 11 : i64} {
  func.func @kernel(%arg0: i32, %arg1: i32, %arg2: i32, %arg3: memref<1x128x128xf32, #tpu.memory_space<vmem>>, %arg4: memref<1x1x128xf32, #tpu.memory_space<vmem>>, %arg5: memref<1x1x128xf32, #tpu.memory_space<vmem>>, %arg6: memref<1x128x128xbf16, #tpu.memory_space<vmem>>, %arg7: memref<1x128x128xbf16, #tpu.memory_space<vmem>>, %arg8: memref<1x128xf32, #tpu.memory_space<vmem>>, %arg9: memref<128x128xbf16, #tpu.memory_space<vmem>>, %arg10: memref<1x128xf32, #tpu.memory_space<vmem>>, %arg11: memref<128x128xbf16, #tpu.memory_space<vmem>>, %arg12: memref<1x128xf32, #tpu.memory_space<vmem>>, %arg13: memref<1x128x128xf32, #tpu.memory_space<vmem>>, %arg14: memref<128x128xbf16, #tpu.memory_space<vmem>>, %arg15: memref<128x1xf32, #tpu.memory_space<vmem>>, %arg16: memref<128x1xf32, #tpu.memory_space<vmem>>, %arg17: memref<128x128xf32, #tpu.memory_space<vmem>>) attributes {dimension_semantics = [#tpu.dimension_semantics<parallel>, #tpu.dimension_semantics<parallel>, #tpu.dimension_semantics<arbitrary>], iteration_bounds = array<i64: 2, 2, 2>, scalar_prefetch = 0 : i64, scratch_operands = 4 : i64, tpu.core_type = #tpu.core_type<tc>, window_params = [{transform_indices = @transform_0, window_bounds = array<i64: 1, 128, 128>}, {transform_indices = @transform_1, window_bounds = array<i64: 1, 1, 128>}, {transform_indices = @transform_2, window_bounds = array<i64: 1, 1, 128>}, {transform_indices = @transform_3, window_bounds = array<i64: 1, 128, 128>}, {transform_indices = @transform_4, window_bounds = array<i64: 1, 128, 128>}, {transform_indices = @transform_5, window_bounds = array<i64: 1, 128>}, {pipeline_mode = #tpu.pipeline_mode<synchronous>, transform_indices = @transform_6, window_bounds = array<i64: 128, 128>}, {pipeline_mode = #tpu.pipeline_mode<synchronous>, transform_indices = @transform_7, window_bounds = array<i64: 1, 128>}, {pipeline_mode = #tpu.pipeline_mode<synchronous>, transform_indices = @transform_8, window_bounds = array<i64: 128, 128>}, {pipeline_mode = #tpu.pipeline_mode<synchronous>, transform_indices = @transform_9, window_bounds = array<i64: 1, 128>}, {transform_indices = @transform_10, window_bounds = array<i64: 1, 128, 128>}]} {
    %c0_i32 = arith.constant 0 : i32
    %0 = arith.cmpi eq, %arg2, %c0_i32 : i32
    %1 = arith.extui %0 : i1 to i32
    %c0_i32_0 = arith.constant 0 : i32
    %2 = arith.cmpi ne, %1, %c0_i32_0 : i32
    scf.if %2 {
      %c0_26 = arith.constant 0 : index
      %c0_27 = arith.constant 0 : index
      %c0_28 = arith.constant 0 : index
      %38 = vector.load %arg3[%c0_26, %c0_27, %c0_28] : memref<1x128x128xf32, #tpu.memory_space<vmem>>, vector<1x128x128xf32>
      %39 = vector.shape_cast %38 : vector<1x128x128xf32> to vector<128x128xf32>
      %c0_29 = arith.constant 0 : index
      %c0_30 = arith.constant 0 : index
      %c0_31 = arith.constant 0 : index
      %40 = vector.load %arg4[%c0_29, %c0_30, %c0_31] : memref<1x1x128xf32, #tpu.memory_space<vmem>>, vector<1x1x128xf32>
      %41 = vector.shape_cast %40 : vector<1x1x128xf32> to vector<1x128xf32>
      %42 = vector.broadcast %41 : vector<1x128xf32> to vector<128x128xf32>
      %43 = arith.mulf %39, %42 : vector<128x128xf32>
      %c0_32 = arith.constant 0 : index
      %c0_33 = arith.constant 0 : index
      %c0_34 = arith.constant 0 : index
      %44 = vector.load %arg5[%c0_32, %c0_33, %c0_34] : memref<1x1x128xf32, #tpu.memory_space<vmem>>, vector<1x1x128xf32>
      %45 = vector.shape_cast %44 : vector<1x1x128xf32> to vector<1x128xf32>
      %46 = vector.broadcast %45 : vector<1x128xf32> to vector<128x128xf32>
      %47 = arith.addf %43, %46 : vector<128x128xf32>
      %48 = arith.truncf %47 : vector<128x128xf32> to vector<128x128xbf16>
      %c0_35 = arith.constant 0 : index
      %c0_36 = arith.constant 0 : index
      %49 = vector.load %arg9[%c0_35, %c0_36] : memref<128x128xbf16, #tpu.memory_space<vmem>>, vector<128x128xbf16>
      %cst_37 = arith.constant dense<0.000000e+00> : vector<128x128xf32>
      %50 = tpu.matmul %48, %49, %cst_37 {dimension_numbers = #tpu.dot_dimension_numbers<[1], [0], [0], [1], [0, 0, 1, 1], [], []>} : vector<128x128xbf16>, vector<128x128xbf16>, vector<128x128xf32> -> vector<128x128xf32>
      %c0_38 = arith.constant 0 : index
      %c0_39 = arith.constant 0 : index
      %51 = vector.load %arg10[%c0_38, %c0_39] : memref<1x128xf32, #tpu.memory_space<vmem>>, vector<1x128xf32>
      %52 = vector.broadcast %51 : vector<1x128xf32> to vector<128x128xf32>
      %53 = arith.addf %50, %52 : vector<128x128xf32>
      %54 = arith.truncf %53 : vector<128x128xf32> to vector<128x128xbf16>
      %c0_40 = arith.constant 0 : index
      %c0_41 = arith.constant 0 : index
      %55 = vector.load %arg14[%c0_40, %c0_41] : memref<128x128xbf16, #tpu.memory_space<vmem>>, vector<128x128xbf16>
      tpu.vector_store %arg14[%c0_40, %c0_41], %54 {strides = array<i32>} : memref<128x128xbf16, #tpu.memory_space<vmem>>, vector<128x128xbf16>,
      %cst_42 = arith.constant -1.000000e+30 : f32
      %56 = vector.broadcast %cst_42 : f32 to vector<128x1xf32>
      %c0_43 = arith.constant 0 : index
      %c0_44 = arith.constant 0 : index
      %57 = vector.load %arg15[%c0_43, %c0_44] : memref<128x1xf32, #tpu.memory_space<vmem>>, vector<128x1xf32>
      tpu.vector_store %arg15[%c0_43, %c0_44], %56 {strides = array<i32>} : memref<128x1xf32, #tpu.memory_space<vmem>>, vector<128x1xf32>,
      %cst_45 = arith.constant 0.000000e+00 : f32
      %58 = vector.broadcast %cst_45 : f32 to vector<128x1xf32>
      %c0_46 = arith.constant 0 : index
      %c0_47 = arith.constant 0 : index
      %59 = vector.load %arg16[%c0_46, %c0_47] : memref<128x1xf32, #tpu.memory_space<vmem>>, vector<128x1xf32>
      tpu.vector_store %arg16[%c0_46, %c0_47], %58 {strides = array<i32>} : memref<128x1xf32, #tpu.memory_space<vmem>>, vector<128x1xf32>,
      %cst_48 = arith.constant 0.000000e+00 : f32
      %60 = vector.broadcast %cst_48 : f32 to vector<128x128xf32>
      %c0_49 = arith.constant 0 : index
      %c0_50 = arith.constant 0 : index
      %61 = vector.load %arg17[%c0_49, %c0_50] : memref<128x128xf32, #tpu.memory_space<vmem>>, vector<128x128xf32>
      tpu.vector_store %arg17[%c0_49, %c0_50], %60 {strides = array<i32>} : memref<128x128xf32, #tpu.memory_space<vmem>>, vector<128x128xf32>,
    } else {
    }
    %c0 = arith.constant 0 : index
    %c0_1 = arith.constant 0 : index
    %3 = vector.load %arg14[%c0, %c0_1] : memref<128x128xbf16, #tpu.memory_space<vmem>>, vector<128x128xbf16>
    %c0_2 = arith.constant 0 : index
    %c0_3 = arith.constant 0 : index
    %c0_4 = arith.constant 0 : index
    %4 = vector.load %arg6[%c0_2, %c0_3, %c0_4] : memref<1x128x128xbf16, #tpu.memory_space<vmem>>, vector<1x128x128xbf16>
    %5 = vector.shape_cast %4 : vector<1x128x128xbf16> to vector<128x128xbf16>
    %cst = arith.constant dense<0.000000e+00> : vector<128x128xf32>
    %6 = tpu.matmul %3, %5, %cst {dimension_numbers = #tpu.dot_dimension_numbers<[1], [0], [0], [1], [0, 0, 1, 1], [], []>} : vector<128x128xbf16>, vector<128x128xbf16>, vector<128x128xf32> -> vector<128x128xf32>
    %c0_5 = arith.constant 0 : index
    %c0_6 = arith.constant 0 : index
    %7 = vector.load %arg8[%c0_5, %c0_6] : memref<1x128xf32, #tpu.memory_space<vmem>>, vector<1x128xf32>
    %8 = vector.broadcast %7 : vector<1x128xf32> to vector<128x128xf32>
    %9 = arith.addf %6, %8 : vector<128x128xf32>
    %c0_7 = arith.constant 0 : index
    %c0_8 = arith.constant 0 : index
    %10 = vector.load %arg15[%c0_7, %c0_8] : memref<128x1xf32, #tpu.memory_space<vmem>>, vector<128x1xf32>
    %cst_9 = arith.constant dense<0xFF800000> : vector<128xf32>
    %11 = vector.multi_reduction <maximumf>, %9, %cst_9 [1] : vector<128x128xf32> to vector<128xf32>
    %12 = vector.shape_cast %11 : vector<128xf32> to vector<128x1xf32>
    %13 = arith.maximumf %10, %12 : vector<128x1xf32>
    %14 = arith.subf %10, %13 : vector<128x1xf32>
    %15 = math.exp %14 : vector<128x1xf32>
    %16 = vector.broadcast %13 : vector<128x1xf32> to vector<128x128xf32>
    %17 = arith.subf %9, %16 : vector<128x128xf32>
    %18 = math.exp %17 : vector<128x128xf32>
    %c0_10 = arith.constant 0 : index
    %c0_11 = arith.constant 0 : index
    %19 = vector.load %arg16[%c0_10, %c0_11] : memref<128x1xf32, #tpu.memory_space<vmem>>, vector<128x1xf32>
    %20 = arith.mulf %15, %19 : vector<128x1xf32>
    %cst_12 = arith.constant dense<0.000000e+00> : vector<128xf32>
    %21 = vector.multi_reduction <add>, %18, %cst_12 [1] : vector<128x128xf32> to vector<128xf32>
    %22 = vector.shape_cast %21 : vector<128xf32> to vector<128x1xf32>
    %23 = arith.addf %20, %22 : vector<128x1xf32>
    %c0_13 = arith.constant 0 : index
    %c0_14 = arith.constant 0 : index
    %24 = vector.load %arg16[%c0_13, %c0_14] : memref<128x1xf32, #tpu.memory_space<vmem>>, vector<128x1xf32>
    tpu.vector_store %arg16[%c0_13, %c0_14], %23 {strides = array<i32>} : memref<128x1xf32, #tpu.memory_space<vmem>>, vector<128x1xf32>,
    %c0_15 = arith.constant 0 : index
    %c0_16 = arith.constant 0 : index
    %25 = vector.load %arg17[%c0_15, %c0_16] : memref<128x128xf32, #tpu.memory_space<vmem>>, vector<128x128xf32>
    %26 = vector.broadcast %15 : vector<128x1xf32> to vector<128x128xf32>
    %27 = arith.mulf %26, %25 : vector<128x128xf32>
    %28 = arith.truncf %18 : vector<128x128xf32> to vector<128x128xbf16>
    %c0_17 = arith.constant 0 : index
    %c0_18 = arith.constant 0 : index
    %c0_19 = arith.constant 0 : index
    %29 = vector.load %arg7[%c0_17, %c0_18, %c0_19] : memref<1x128x128xbf16, #tpu.memory_space<vmem>>, vector<1x128x128xbf16>
    %30 = vector.shape_cast %29 : vector<1x128x128xbf16> to vector<128x128xbf16>
    %cst_20 = arith.constant dense<0.000000e+00> : vector<128x128xf32>
    %31 = tpu.matmul %28, %30, %cst_20 {dimension_numbers = #tpu.dot_dimension_numbers<[1], [0], [0], [1], [0, 0, 1, 1], [], []>} : vector<128x128xbf16>, vector<128x128xbf16>, vector<128x128xf32> -> vector<128x128xf32>
    %32 = arith.addf %27, %31 : vector<128x128xf32>
    %c0_21 = arith.constant 0 : index
    %c0_22 = arith.constant 0 : index
    %33 = vector.load %arg17[%c0_21, %c0_22] : memref<128x128xf32, #tpu.memory_space<vmem>>, vector<128x128xf32>
    tpu.vector_store %arg17[%c0_21, %c0_22], %32 {strides = array<i32>} : memref<128x128xf32, #tpu.memory_space<vmem>>, vector<128x128xf32>,
    %c0_23 = arith.constant 0 : index
    %c0_24 = arith.constant 0 : index
    %34 = vector.load %arg15[%c0_23, %c0_24] : memref<128x1xf32, #tpu.memory_space<vmem>>, vector<128x1xf32>
    tpu.vector_store %arg15[%c0_23, %c0_24], %13 {strides = array<i32>} : memref<128x1xf32, #tpu.memory_space<vmem>>, vector<128x1xf32>,
    %c1_i32 = arith.constant 1 : i32
    %35 = arith.cmpi eq, %arg2, %c1_i32 : i32
    %36 = arith.extui %35 : i1 to i32
    %c0_i32_25 = arith.constant 0 : i32
    %37 = arith.cmpi ne, %36, %c0_i32_25 : i32
    scf.if %37 {
      %c0_26 = arith.constant 0 : index
      %c0_27 = arith.constant 0 : index
      %38 = vector.load %arg17[%c0_26, %c0_27] : memref<128x128xf32, #tpu.memory_space<vmem>>, vector<128x128xf32>
      %c0_28 = arith.constant 0 : index
      %c0_29 = arith.constant 0 : index
      %39 = vector.load %arg16[%c0_28, %c0_29] : memref<128x1xf32, #tpu.memory_space<vmem>>, vector<128x1xf32>
      %40 = tpu.reciprocal %39 {approx = true} : vector<128x1xf32> -> vector<128x1xf32>
      %41 = vector.broadcast %40 : vector<128x1xf32> to vector<128x128xf32>
      %42 = arith.mulf %38, %41 : vector<128x128xf32>
      %43 = arith.truncf %42 : vector<128x128xf32> to vector<128x128xbf16>
      %c0_30 = arith.constant 0 : index
      %c0_31 = arith.constant 0 : index
      %44 = vector.load %arg11[%c0_30, %c0_31] : memref<128x128xbf16, #tpu.memory_space<vmem>>, vector<128x128xbf16>
      %cst_32 = arith.constant dense<0.000000e+00> : vector<128x128xf32>
      %45 = tpu.matmul %43, %44, %cst_32 {dimension_numbers = #tpu.dot_dimension_numbers<[1], [0], [0], [1], [0, 0, 1, 1], [], []>} : vector<128x128xbf16>, vector<128x128xbf16>, vector<128x128xf32> -> vector<128x128xf32>
      %c0_33 = arith.constant 0 : index
      %c0_34 = arith.constant 0 : index
      %46 = vector.load %arg12[%c0_33, %c0_34] : memref<1x128xf32, #tpu.memory_space<vmem>>, vector<1x128xf32>
      %47 = vector.broadcast %46 : vector<1x128xf32> to vector<128x128xf32>
      %48 = arith.addf %45, %47 : vector<128x128xf32>
      %c0_35 = arith.constant 0 : index
      %c0_36 = arith.constant 0 : index
      %c0_37 = arith.constant 0 : index
      %49 = vector.load %arg3[%c0_35, %c0_36, %c0_37] : memref<1x128x128xf32, #tpu.memory_space<vmem>>, vector<1x128x128xf32>
      %50 = vector.shape_cast %49 : vector<1x128x128xf32> to vector<128x128xf32>
      %51 = arith.addf %48, %50 : vector<128x128xf32>
      %c0_38 = arith.constant 0 : index
      %c0_39 = arith.constant 0 : index
      %c0_40 = arith.constant 0 : index
      %52 = vector.load %arg13[%c0_38, %c0_39, %c0_40] : memref<1x128x128xf32, #tpu.memory_space<vmem>>, vector<1x128x128xf32>
      %53 = vector.shape_cast %52 : vector<1x128x128xf32> to vector<128x128xf32>
      %54 = vector.shape_cast %51 : vector<128x128xf32> to vector<1x128x128xf32>
      tpu.vector_store %arg13[%c0_38, %c0_39, %c0_40], %54 {strides = array<i32>} : memref<1x128x128xf32, #tpu.memory_space<vmem>>, vector<1x128x128xf32>,
    } else {
    }
    return
  }
  func.func @transform_0(%arg0: i32, %arg1: i32, %arg2: i32) -> (i32, i32, i32) {
    %c0_i32 = arith.constant 0 : i32
    %c0_i32_0 = arith.constant 0 : i32
    return %arg0, %arg1, %c0_i32 : i32, i32, i32
  }
  func.func @transform_1(%arg0: i32, %arg1: i32, %arg2: i32) -> (i32, i32, i32) {
    %c0_i32 = arith.constant 0 : i32
    %c0_i32_0 = arith.constant 0 : i32
    %c0_i32_1 = arith.constant 0 : i32
    return %arg0, %c0_i32, %c0_i32_0 : i32, i32, i32
  }
  func.func @transform_2(%arg0: i32, %arg1: i32, %arg2: i32) -> (i32, i32, i32) {
    %c0_i32 = arith.constant 0 : i32
    %c0_i32_0 = arith.constant 0 : i32
    %c0_i32_1 = arith.constant 0 : i32
    return %arg0, %c0_i32, %c0_i32_0 : i32, i32, i32
  }
  func.func @transform_3(%arg0: i32, %arg1: i32, %arg2: i32) -> (i32, i32, i32) {
    %c0_i32 = arith.constant 0 : i32
    %c0_i32_0 = arith.constant 0 : i32
    return %arg0, %c0_i32, %arg2 : i32, i32, i32
  }
  func.func @transform_4(%arg0: i32, %arg1: i32, %arg2: i32) -> (i32, i32, i32) {
    %c0_i32 = arith.constant 0 : i32
    %c0_i32_0 = arith.constant 0 : i32
    return %arg0, %arg2, %c0_i32 : i32, i32, i32
  }
  func.func @transform_5(%arg0: i32, %arg1: i32, %arg2: i32) -> (i32, i32) {
    %c0_i32 = arith.constant 0 : i32
    %c0_i32_0 = arith.constant 0 : i32
    return %c0_i32, %arg2 : i32, i32
  }
  func.func @transform_6(%arg0: i32, %arg1: i32, %arg2: i32) -> (i32, i32) {
    %c0_i32 = arith.constant 0 : i32
    %c0_i32_0 = arith.constant 0 : i32
    %c0_i32_1 = arith.constant 0 : i32
    return %c0_i32, %c0_i32_0 : i32, i32
  }
  func.func @transform_7(%arg0: i32, %arg1: i32, %arg2: i32) -> (i32, i32) {
    %c0_i32 = arith.constant 0 : i32
    %c0_i32_0 = arith.constant 0 : i32
    %c0_i32_1 = arith.constant 0 : i32
    return %c0_i32, %c0_i32_0 : i32, i32
  }
  func.func @transform_8(%arg0: i32, %arg1: i32, %arg2: i32) -> (i32, i32) {
    %c0_i32 = arith.constant 0 : i32
    %c0_i32_0 = arith.constant 0 : i32
    %c0_i32_1 = arith.constant 0 : i32
    return %c0_i32, %c0_i32_0 : i32, i32
  }
  func.func @transform_9(%arg0: i32, %arg1: i32, %arg2: i32) -> (i32, i32) {
    %c0_i32 = arith.constant 0 : i32
    %c0_i32_0 = arith.constant 0 : i32
    %c0_i32_1 = arith.constant 0 : i32
    return %c0_i32, %c0_i32_0 : i32, i32
  }
  func.func @transform_10(%arg0: i32, %arg1: i32, %arg2: i32) -> (i32, i32, i32) {
    %c0_i32 = arith.constant 0 : i32
    %c0_i32_0 = arith.constant 0 : i32
    return %arg0, %arg1, %c0_i32 : i32, i32, i32
  }
}

</mosaic_0001>

<bundles_post_ra>
// kernel: tpu_custom_call.1
= control target key start
LH: loop header
LB: loop body
LE: loop exit
PB: predicated region body
PF: predicated region fallthrough
CT: control target
= control target key end

     0   :  { %s4228_s0 = inlined_call_operand.hbm [shape: f32[2,256,128], index: 0, kind: input, shape index: {}]   ;;  %s4229_s1 = inlined_call_operand.vmem [shape: f32[2,1,128], index: 1, kind: input, shape index: {}]   ;;  %s4230_s2 = inlined_call_operand.vmem [shape: f32[2,1,128], index: 2, kind: input, shape index: {}]   ;;  %s4231_s3 = inlined_call_operand.hbm [shape: bf16[2,128,256], index: 3, kind: input, shape index: {}]   ;;  %s4232_s4 = inlined_call_operand.hbm [shape: bf16[2,256,128], index: 4, kind: input, shape index: {}]   ;;  %s4233_s5 = inlined_call_operand.vmem [shape: f32[1,256], index: 5, kind: input, shape index: {}]   ;;  %s4234_s6 = inlined_call_operand.hbm [shape: bf16[128,128], index: 6, kind: input, shape index: {}]   ;;  %s4235_s7 = inlined_call_operand.vmem [shape: f32[1,128], index: 7, kind: input, shape index: {}]   ;;  %s4236_s8 = inlined_call_operand.hbm [shape: bf16[128,128], index: 8, kind: input, shape index: {}]   ;;  %s4237_s9 = inlined_call_operand.vmem [shape: f32[1,128], index: 9, kind: input, shape index: {}]   ;;  %s4238_s10 = inlined_call_operand.hbm [shape: f32[2,256,128], index: 10, kind: output, shape index: {}]  }
   0x1   :  { %4272 = sst [smem:[#allocation34_spill]] %s4228_s0 }
   0x2   :  { %4273 = sst [smem:[#allocation35_spill]] %s4229_s1 }
   0x3   :  { %4274 = sst [smem:[#allocation36_spill]] %s4230_s2 }
   0x4   :  { %4275 = sst [smem:[#allocation37_spill]] %s4231_s3 }
   0x5   :  { %4276 = sst [smem:[#allocation38_spill]] %s4233_s5 }
   0x6   :  { %4277 = sst [smem:[#allocation39_spill]] %s4234_s6 }
   0x7   :  { %4278 = sst [smem:[#allocation40_spill]] %s4235_s7 }
   0x8   :  { %4279 = sst [smem:[#allocation41_spill]] %s4236_s8 }
   0x9   :  { %4280 = sst [smem:[#allocation42_spill]] %s4237_s9 }
   0xa   :  { %4281 = sst [smem:[#allocation43_spill]] %s4238_s10 }
   0xb   :  { %15 = vsyncpa [#allocation7], 0 }
   0xc   :  { %17 = vsyncpa [#allocation7 + $0x1], 0 }
   0xd   :  { %18 = vsyncpa [#allocation10], 0 }
   0xe   :  { %20 = vsyncpa [#allocation10 + $0x1], 0 }
   0xf   :  { %21 = vsyncpa [#allocation13], 0 }
  0x10   :  { %22 = vsyncpa [#allocation8], 0 }
  0x11   :  { %24 = vsyncpa [#allocation8 + $0x1], 0  ;;  %s3238_s13 = smov 0   ;;  %s3240_s14 = smov 0  }
  0x12   :  { %s3242_s15 = smov 0   ;;  %s3244_s16 = smov 0  }
  0x13   :  { %s3246_s17 = smov 0   ;;  %s3248_s18 = smov 0  }
  0x14   :  { %s3250_s19 = smov 0   ;;  %s3252_s20 = smov 0  }
  0x15   :  { %s3254_s21 = smov 0   ;;  %s3256_s22 = smov 0  }
  0x16   :  { %s3258_s23 = smov 0   ;;  %s3260_s24 = smov 0  }
  0x17   :  { %s3262_s25 = smov 0  }
  0x18 LB: > { %4282 = sst [smem:[#allocation20_spill]] %s3121_s14  ;;  %s3302_s26 = sadd.s32 4294967295, %s3165_s25   ;;  %s3165_s25 = sphi %s3262_s25, %s30_s25   ;;  %s3161_s24 = sphi %s3260_s24, %s4365_s24   ;;  %s3157_s23 = sphi %s3258_s23, %s4357_s23   ;;  %s3153_s22 = sphi %s3256_s22, %s4364_s22   ;;  %s3149_s21 = sphi %s3254_s21, %s4363_s21   ;;  %s3145_s20 = sphi %s3252_s20, %s4356_s20   ;;  %s3141_s19 = sphi %s3250_s19, %s4362_s19   ;;  %s3137_s18 = sphi %s3248_s18, %s4361_s18   ;;  %s3133_s17 = sphi %s3246_s17, %s4360_s17   ;;  %s3129_s16 = sphi %s3244_s16, %s4355_s16   ;;  %s3125_s15 = sphi %s3242_s15, %s4359_s15   ;;  %s3121_s14 = sphi %s3240_s14, %s4358_s14   ;;  %s3117_s13 = sphi %s3238_s13, %s4354_s13  }
  0x19   : > { %4283 = sst [smem:[#allocation21_spill]] %s3129_s16  ;;  %s2290_s27 = sadd.s32 4294967294, %s3165_s25  }
  0x1a   : > { %4284 = sst [smem:[#allocation22_spill]] %s3133_s17  ;;  %p71_p0 = scmp.ne.s32.totalorder %s3133_s17, %s3129_s16 }
  0x1b   : > { %4285 = sst [smem:[#allocation23_spill]] %s3141_s19  ;;  %p4242_p1 = scmp.eq.s32.totalorder %s3302_s26, 0 }
  0x1c   : > { %4286 = sst [smem:[#allocation24_spill]] %s3145_s20  ;;  %p151_p2 = scmp.ne.s32.totalorder %s3121_s14, %s3117_s13 }
  0x1d   : > { %4287 = sst [smem:[#allocation25_spill]] %s3149_s21  ;;  %p3312_p4 = por %p4242_p1, %p71_p0 }
  0x1e   : > { %4288 = sst [smem:[#allocation26_spill]] %s3157_s23  ;;  %p321_p5 = scmp.eq.s32.totalorder %s2290_s27, 7 }
  0x1f   : > { %4289 = sst [smem:[#allocation27_spill]] %s3302_s26  ;;  %p3318_p6 = por %p151_p2, %p4242_p1 }
  0x20   : > { %s4290_s28 = scalar_select %p3312_p4, 1, 0 }
  0x21   : > { %s4292_s29 = scalar_select %p3318_p6, 1, 0 }
  0x22   : > { %4291 = sst [smem:[#allocation28_spill]] %s4290_s28  ;;  %p2291_p7 = scmp.ge.s32.totalorder %s3165_s25, 1 }
  0x23   : > { %4293 = sst [smem:[#allocation29_spill]] %s4292_s29  ;;  %p3323_p8 = por %p321_p5, %p71_p0 }
  0x24   : > { %p328_p9 = scmp.lt.s32.totalorder %s3165_s25, 9  ;;  %s3167_s12 = smov [#allocation12]  }
  0x25   : > { %s4294_s30 = scalar_select %p3323_p8, 1, 0 }
  0x26   : > { %p3328_p10 = pnand %p2291_p7, %p328_p9  ;;  %s340_s13 = sshll.u32 %s3167_s12, 4  ;;  %s341_s13 = int_to_ptr.vmem [resolvable:$true] %s340_s13 }
  0x27   : > { %4295 = sst [smem:[#allocation30_spill]] %s4294_s30 }
  0x28   : > { %s4296_s11 = scalar_select %p3328_p10, 1, 0 }
  0x29   : > { %p2598_p11 = pneg %p3328_p10  ;;  %s4299_s6 = sld [smem:[#allocation39_spill]] }
  0x2a   : > { %4297 = sst [smem:[#allocation31_spill]] %s4296_s11 }
  0x2b   : > { %p3336_p12 = pnand %p2598_p11, %p4242_p1 }
  0x2d   : > { %p4259_p0 = pneg %p3336_p12 }
  0x2f   : > { %s2873_s30 = scalar_lea.hbm %s4299_s6, 1024 }
  0x30   : > { %p2874_p13 = scmp.ne.s32.totalorder %s4299_s6, %s2873_s30  ;;  %p2880_p7 = scmp.lt.u32.totalorder %s2873_s30, %s4299_s6 }
  0x32   : > { %p2876_p2 = pnand %p4259_p0, %p2874_p13 }
  0x34   : > { %p2877_p5 = pneg %p2876_p2 }
  0x36   : > { %p2882_p9 = pnand %p2880_p7, %p2877_p5 }
  0x38   : > { %2885 = shalt.err (!%p2882_p9)
}
  0x39   : > { %s2886_s10 = scalar_lea.vmem %s341_s13, 1024  ;;  %p2894_p8 = scmp.lt.s32.totalorder %s341_s13, %s341_s13 }
  0x3a   : > { %p2887_p11 = scmp.ne.s32.totalorder %s341_s13, %s2886_s10  ;;  %p2895_p6 = scmp.lt.s32.totalorder %s2886_s10, %s2886_s10 }
  0x3c   : > { %p2889_p1 = pnand %p2887_p11, %p4259_p0  ;;  %p2896_p4 = por %p2895_p6, %p2894_p8 }
  0x3e   : > { %p2890_p3 = pneg %p2889_p1 }
  0x40   : > { %p2897_p10 = pnand %p2896_p4, %p2890_p3 }
  0x42   : > { %2900 = shalt.err (!%p2897_p10)
}
  0x43   : > { %s4246_s9 = smov 64   ;;  %s4248_s7 = smov 4  }
  0x44   : > { %2601 = dma.hbm_to_vmem [thread:$0]  (!%p3336_p12), %s4299_s6, 1024, %s341_s13, [#allocation13], %s4246_s9, %s4246_s9, %s4248_s7  }
  0x45   : > { %s42_s30 = sadd.s32 1, %s3153_s22  ;;  %p4258_p3 = scmp.eq.s32.totalorder %s3165_s25, 0 }
  0x46   : > { %p3366_p1 = scmp.ge.s32.totalorder %s42_s30, 2  ;;  %p145_p4 = scmp.ne.s32.totalorder %s3125_s15, %s3121_s14 }
  0x47   : > { %p4257_p6 = scmp.lt.s32.totalorder %s3165_s25, 8  ;;  %s3383_s16 = sshll.u32 %s3161_s24, 5 }
  0x48   : > { %s4300_s12 = scalar_select %p3366_p1, 1, 0 }
  0x49   : > { %s4367_s30 = smov (%p3366_p1, %s42_s30), 0  ;;  %p147_p8 = por %p145_p4, %p4258_p3 }
  0x4a   : > { %s408_s13 = sand.u32 1, %s3165_s25   ;;  %s410_s20 = sand.u32 1, %s3125_s15  }
  0x4b   : > { %s3389_s9 = sshll.u32 %s410_s20, 6  ;;  %s417_s10 = sadd.s32 %s3153_s22, %s3383_s16 }
  0x4c   : > { %s2301_s5 = sshll.u32 %s417_s10, 6  ;;  %s412_s7 = scalar_lea.vmem [#allocation9], %s3389_s9 }
  0x4d   : > { %s420_s6 = sshll.u32 %s412_s7, 4  ;;  %s4301_s3 = sld [smem:[#allocation37_spill]]  ;;  %s3399_s6 = int_to_ptr.vmem [resolvable:$true] %s420_s6 }
  0x4e   : > { %p3403_p10 = pnand %p4257_p6, %p147_p8  ;;  %s3170_s10 = smov [#allocation14]  }
  0x4f   : > { %s356_s7 = sshll.u32 %s3170_s10, 4  ;;  %s3409_s1 = scalar_lea.sflag [#allocation10], %s408_s13  ;;  %s3407_s7 = int_to_ptr.vmem [resolvable:$true] %s356_s7 }
  0x50   : > { %p4270_p2 = pneg %p3403_p10 }
  0x53   : > { %s3397_s21 = scalar_lea.hbm %s4301_s3, %s2301_s5  ;;  %s2906_s29 = scalar_lea.hbm %s4301_s3, 4096 }
  0x54   : > { %s2901_s5 = scalar_lea.hbm %s3397_s21, 1024  ;;  %p2907_p9 = scmp.lt.u32.totalorder %s3397_s21, %s4301_s3 }
  0x55   : > { %p2902_p13 = scmp.ne.s32.totalorder %s3397_s21, %s2901_s5  ;;  %p2908_p11 = scmp.lt.u32.totalorder %s2906_s29, %s2901_s5 }
  0x56   : > { %p2910_p8 = scmp.lt.u32.totalorder %s2901_s5, %s3397_s21 }
  0x57   : > { %p2904_p5 = pnand %p4270_p2, %p2902_p13  ;;  %p2909_p4 = por %p2908_p11, %p2907_p9 }
  0x59   : > { %p2905_p7 = pneg %p2904_p5  ;;  %p2911_p6 = por %p2910_p8, %p2909_p4 }
  0x5b   : > { %p2912_p3 = pnand %p2911_p6, %p2905_p7 }
  0x5d   : > { %2915 = shalt.err (!%p2912_p3)
}
  0x5e   : > { %s2916_s13 = scalar_lea.vmem %s3399_s6, 1024  ;;  %s3171_s2 = smov [#allocation9]  }
  0x5f   : > { %p2917_p13 = scmp.ne.s32.totalorder %s3399_s6, %s2916_s13  ;;  %s2921_s10 = sshll.u32 %s3171_s2, 4  ;;  %s2922_s10 = int_to_ptr.vmem [resolvable:$false] %s2921_s10 }
  0x60   : > { %s2923_s14 = scalar_lea.vmem %s2922_s10, 2048  ;;  %p2924_p1 = scmp.lt.s32.totalorder %s3399_s6, %s2922_s10 }
  0x61   : > { %p2919_p5 = pnand %p2917_p13, %p4270_p2  ;;  %p2925_p9 = scmp.lt.s32.totalorder %s2923_s14, %s2916_s13 }
  0x63   : > { %p2920_p0 = pneg %p2919_p5  ;;  %p2926_p11 = por %p2925_p9, %p2924_p1 }
  0x65   : > { %p2927_p4 = pnand %p2926_p11, %p2920_p0 }
  0x67   : > { %2930 = shalt.err (!%p2927_p4)
}
  0x68   : > { %s4262_s28 = smov 128   ;;  %s4303_s29 = smov 4  }
  0x69   : > { %s4304_s5 = smov 64   ;;  %s4305_s8 = sld [smem:[#allocation41_spill]] }
  0x6a   : > { %2611 = dma.hbm_to_vmem [thread:$0]  (!%p3403_p10), %s3397_s21, 1024, %s3399_s6, %s3409_s1, %s4262_s28, %s4304_s5, %s4303_s29  }
  0x6b   : > { %p4306_p1 = pneg %p3336_p12 }
  0x6f   : > { %s2931_s3 = scalar_lea.hbm %s4305_s8, 1024 }
  0x70   : > { %p2932_p0 = scmp.ne.s32.totalorder %s4305_s8, %s2931_s3  ;;  %p2938_p7 = scmp.lt.u32.totalorder %s2931_s3, %s4305_s8 }
  0x72   : > { %p2934_p3 = pnand %p2932_p0, %p4306_p1 }
  0x74   : > { %p2935_p6 = pneg %p2934_p3 }
  0x76   : > { %p2940_p8 = pnand %p2938_p7, %p2935_p6 }
  0x78   : > { %2943 = shalt.err (!%p2940_p8)
}
  0x79   : > { %s2944_s6 = scalar_lea.vmem %s3407_s7, 1024  ;;  %p4307_p5 = pmov %p4306_p1 }
  0x7a   : > { %p2945_p13 = scmp.ne.s32.totalorder %s3407_s7, %s2944_s6  ;;  %p2952_p4 = scmp.lt.s32.totalorder %s3407_s7, %s3407_s7 }
  0x7b   : > { %p2953_p0 = scmp.lt.s32.totalorder %s2944_s6, %s2944_s6 }
  0x7c   : > { %p2947_p9 = pnand %p2945_p13, %p4307_p5 }
  0x7d   : > { %p2954_p1 = por %p2953_p0, %p2952_p4 }
  0x7e   : > { %p2948_p11 = pneg %p2947_p9 }
  0x80   : > { %p2955_p3 = pnand %p2954_p1, %p2948_p11 }
  0x82   : > { %2958 = shalt.err (!%p2955_p3)
}
  0x83   : > { %2604 = dma.hbm_to_vmem [thread:$0]  (!%p3336_p12), %s4305_s8, 1024, %s3407_s7, [#allocation13], %s4304_s5, %s4304_s5, %s4303_s29  }
  0x84   : > { %s58_s11 = sadd.s32 1, %s3137_s18  ;;  %s45_s27 = sadd.s32 1, %s3157_s23 }
  0x85   : > { %p65_p6 = scmp.ne.s32.totalorder %s3137_s18, %s3133_s17  ;;  %p4308_p7 = scmp.ne.s32.totalorder %s4300_s12, 0 }
  0x86   : > { %p4309_p8 = scmp.eq.s32.totalorder %s3165_s25, 0  ;;  %p4311_p5 = scmp.eq.s32.totalorder %s3302_s26, 7 }
  0x87   : > { %s4369_s27 = smov (!%p4308_p7, %s45_s27), %s3157_s23  ;;  %s373_s10 = sand.u32 1, %s3137_s18  }
  0x88   : > { %p3477_p13 = por %p4309_p8, %p65_p6  ;;  %p3483_p9 = por %p4311_p5, %p65_p6 }
  0x89   : > { %p47_p11 = scmp.ge.s32.totalorder %s4369_s27, 2  ;;  %s2295_s7 = sshll.u32 %s373_s10, 7 }
  0x8a   : > { %s4312_s2 = scalar_select %p3483_p9, 1, 0 }
  0x8b   : > { %s4371_s27 = smov (%p47_p11, %s4369_s27), 0  ;;  %s4315_s12 = sadd.s32 1, %s3161_s24 }
  0x8c   : > { %4313 = sst [smem:[#allocation32_spill]] %s4312_s2  ;;  %s4373_s12 = smov (!%p47_p11, %s4315_s12), %s3161_s24 }
  0x8d   : > { %4314 = sst [smem:[#allocation33_spill]] %s4371_s27  ;;  %s54_s13 = ssub.s32 %s3157_s23, %s4371_s27 }
  0x8e   : > { %p51_p12 = scmp.ge.s32.totalorder %s4373_s12, 2  ;;  %s2296_s14 = sshll.u32 %s3157_s23, 4 }
  0x8f   : > { %s383_s6 = sadd.s32 %s3383_s16, %s2296_s14  ;;  %s377_s3 = scalar_lea.vmem [#allocation6], %s2295_s7 }
  0x90   : > { %s386_s21 = sshll.u32 %s377_s3, 4  ;;  %s4375_s12 = smov (%p51_p12, %s4373_s12), 0  ;;  %s3499_s21 = int_to_ptr.vmem [resolvable:$true] %s386_s21 }
  0x91   : > { %s2298_s28 = sshll.u32 %s383_s6, 7  ;;  %s53_s8 = ssub.s32 %s3161_s24, %s4375_s12 }
  0x92   : > { %s4316_s0 = sld [smem:[#allocation34_spill]]  ;;  %s55_s27 = sor.u32 %s54_s13, %s53_s8 }
  0x93   : > { %s4317_s23 = ssub.s32 %s3153_s22, %s4367_s30  ;;  %p56_p4 = scmp.eq.s32.totalorder %s55_s27, 0 }
  0x94   : > { %s135_s14 = sor.u32 %s4317_s23, %s53_s8  ;;  %p4318_p1 = scmp.lt.s32.totalorder %s3165_s25, 8 }
  0x95   : > { %p136_p0 = scmp.eq.s32.totalorder %s135_s14, 0  ;;  %s3527_s6 = scalar_lea.sflag [#allocation7], %s373_s10 }
  0x96   : > { %p3515_p3 = pnand %p4318_p1, %p3477_p13 }
  0x97   : > { %s3520_s26 = scalar_select %p56_p4, %s3137_s18, %s58_s11  }
  0x98   : > { %s3506_s17 = scalar_lea.hbm %s4316_s0, %s2298_s28  ;;  %s4320_s28 = sadd.s32 1, %s3125_s15 }
  0x99   : > { %s3525_s2 = scalar_select %p136_p0, %s3125_s15, %s4320_s28  }
  0x9a   : > { %s2959_s13 = scalar_lea.hbm %s3506_s17, 2048  ;;  %p2961_p7 = pneg %p3515_p3 }
  0x9b   : > { %p2960_p6 = scmp.ne.s32.totalorder %s3506_s17, %s2959_s13  ;;  %s2964_s27 = scalar_lea.hbm %s4316_s0, 8192 }
  0x9c   : > { %p2965_p5 = scmp.lt.u32.totalorder %s3506_s17, %s4316_s0  ;;  %p2966_p11 = scmp.lt.u32.totalorder %s2964_s27, %s2959_s13 }
  0x9d   : > { %p2962_p8 = pnand %p2961_p7, %p2960_p6  ;;  %p2968_p4 = scmp.lt.u32.totalorder %s2959_s13, %s3506_s17 }
  0x9e   : > { %p2967_p12 = por %p2966_p11, %p2965_p5 }
  0x9f   : > { %p2963_p13 = pneg %p2962_p8 }
  0xa0   : > { %p2969_p0 = por %p2968_p4, %p2967_p12 }
  0xa2   : > { %p2970_p1 = pnand %p2969_p0, %p2963_p13 }
  0xa4   : > { %2973 = shalt.err (!%p2970_p1)
}
  0xa5   : > { %s2974_s10 = scalar_lea.vmem %s3499_s21, 2048  ;;  %s3173_s3 = smov [#allocation6]  }
  0xa6   : > { %p2975_p6 = scmp.ne.s32.totalorder %s3499_s21, %s2974_s10  ;;  %s2979_s14 = sshll.u32 %s3173_s3, 4  ;;  %s2980_s14 = int_to_ptr.vmem [resolvable:$false] %s2979_s14 }
  0xa7   : > { %s2981_s28 = scalar_lea.vmem %s2980_s14, 4096  ;;  %p2982_p9 = scmp.lt.s32.totalorder %s3499_s21, %s2980_s14 }
  0xa8   : > { %p2977_p8 = pnand %p2975_p6, %p2961_p7  ;;  %p2983_p5 = scmp.lt.s32.totalorder %s2981_s28, %s2974_s10 }
  0xaa   : > { %p2978_p2 = pneg %p2977_p8  ;;  %p2984_p11 = por %p2983_p5, %p2982_p9 }
  0xac   : > { %p2985_p12 = pnand %p2984_p11, %p2978_p2 }
  0xae   : > { %2988 = shalt.err (!%p2985_p12)
}
  0xaf   : > { %s3174_s13 = smov 8   ;;  %s4321_s8 = smov 128  }
  0xb0   : > { %2608 = dma.hbm_to_vmem [thread:$0]  (!%p3515_p3), %s3506_s17, 2048, %s3499_s21, %s3527_s6, %s4321_s8, %s4321_s8, %s3174_s13  }
  0xb1   : > { %s2303_s23 = sshll.u32 %s3153_s22, 4  ;;  %s434_s27 = scalar_lea.vmem [#allocation11], %s3389_s9 }
  0xb2   : > { %s443_s19 = sshll.u32 %s434_s27, 4  ;;  %s440_s11 = sadd.s32 %s2303_s23, %s3383_s16  ;;  %s3560_s19 = int_to_ptr.vmem [resolvable:$true] %s443_s19 }
  0xb3   : > { %s2305_s10 = sshll.u32 %s440_s11, 6  ;;  %p4322_p9 = pneg %p3403_p10 }
  0xb4   : > { %s3565_s7 = scalar_lea.hbm %s4232_s4, %s2305_s10  ;;  %s2994_s16 = scalar_lea.hbm %s4232_s4, 4096 }
  0xb5   : > { %s2989_s28 = scalar_lea.hbm %s3565_s7, 1024  ;;  %p2995_p13 = scmp.lt.u32.totalorder %s3565_s7, %s4232_s4 }
  0xb6   : > { %p2990_p2 = scmp.ne.s32.totalorder %s3565_s7, %s2989_s28  ;;  %p2996_p4 = scmp.lt.u32.totalorder %s2994_s16, %s2989_s28 }
  0xb7   : > { %p2998_p1 = scmp.lt.u32.totalorder %s2989_s28, %s3565_s7 }
  0xb8   : > { %p2992_p3 = pnand %p2990_p2, %p4322_p9  ;;  %p2997_p0 = por %p2996_p4, %p2995_p13 }
  0xba   : > { %p2993_p7 = pneg %p2992_p3  ;;  %p2999_p6 = por %p2998_p1, %p2997_p0 }
  0xbc   : > { %p3000_p8 = pnand %p2999_p6, %p2993_p7 }
  0xbe   : > { %3003 = shalt.err (!%p3000_p8)
}
  0xbf   : > { %s3004_s13 = scalar_lea.vmem %s3560_s19, 1024  ;;  %p4323_p11 = pmov %p4322_p9 }
  0xc0   : > { %p3005_p5 = scmp.ne.s32.totalorder %s3560_s19, %s3004_s13  ;;  %s3175_s8 = smov [#allocation11]  }
  0xc1   : > { %s3009_s23 = sshll.u32 %s3175_s8, 4  ;;  %s3010_s23 = int_to_ptr.vmem [resolvable:$false] %s3009_s23 }
  0xc2   : > { %p3007_p12 = pnand %p3005_p5, %p4323_p11  ;;  %s3011_s27 = scalar_lea.vmem %s3010_s23, 2048 }
  0xc3   : > { %p3012_p9 = scmp.lt.s32.totalorder %s3560_s19, %s3010_s23  ;;  %p3013_p3 = scmp.lt.s32.totalorder %s3011_s27, %s3004_s13 }
  0xc4   : > { %p3008_p2 = pneg %p3007_p12 }
  0xc5   : > { %p3014_p13 = por %p3013_p3, %p3012_p9 }
  0xc7   : > { %p3015_p4 = pnand %p3014_p13, %p3008_p2 }
  0xc9   : > { %3018 = shalt.err (!%p3015_p4)
}
  0xca   : > { %2614 = dma.hbm_to_vmem [thread:$0]  (!%p3403_p10), %s3565_s7, 1024, %s3560_s19, %s3409_s1, %s4304_s5, %s4304_s5, %s4303_s29  }
  0xcb   : > { %s4324_s11 = sld [smem:[#allocation31_spill]] }
  0xd1   : > { %p4325_p7 = scmp.ne.s32.totalorder %s4324_s11, 0 }
  0xd2   : > { %s4326_s10 = sld [smem:[#allocation22_spill]] (!%p4325_p7) }
  0xd3   : > { %461 = sbr.rel (%p4325_p7) target bundleno = 1685 (0x695), region = 60  ;;  %s4327_s3 = sld [smem:[#allocation28_spill]] (!%p4325_p7) }
  0xd8   : > { %s3597_s14 = sand.u32 (!%p4325_p7), 1, %s4326_s10  }
  0xd9   : > { %s2307_s28 = sshll.u32 (!%p4325_p7), %s3597_s14, 7  ;;  %s464_s17 = scalar_lea.sflag (!%p4325_p7), [#allocation7], %s3597_s14 }
  0xda   : > { %s3601_s9 = scalar_lea.vmem [#allocation6], %s2307_s28  ;;  %p4328_p0 = scmp.ne.s32.totalorder %s4327_s3, 0 }
  0xdc   : > { %3100 = dma.done.wait (%p4328_p0), %s464_s17, 2048  }
  0xdd   : > { %3102 = vsyncadd (%p4328_p0), %s464_s17, 4294965248  ;;  %s4329_s20 = sld [smem:[#allocation27_spill]]  ;;  %s4331_s29 = sld [smem:[#allocation29_spill]] }
  0xde   : > { %s4330_s1 = sld [smem:[#allocation20_spill]] }
  0xe3   : > { %s472_s5 = sand.u32 1, %s4329_s20   ;;  %p4332_p10 = scmp.ne.s32.totalorder %s4331_s29, 0 }
  0xe4   : > { %s474_s19 = sand.u32 1, %s4330_s1   ;;  %s473_s16 = scalar_lea.sflag [#allocation10], %s472_s5 }
  0xe5   : > { %s2308_s7 = sshll.u32 %s474_s19, 6 }
  0xe6   : > { %s3609_s21 = scalar_lea.vmem [#allocation9], %s2308_s7 }
  0xe7   : > { %3104 = dma.done.wait (%p4332_p10), %s473_s16, 2048  }
  0xe8   : > { %3106 = vsyncadd (%p4332_p10), %s473_s16, 4294965248  ;;  %s3615_s6 = scalar_lea.vmem [#allocation11], %s2308_s7  ;;  %p4333_p1 = scmp.eq.s32.totalorder %s4329_s20, 0 }
  0xea   : > { %3108 = dma.done.wait (%p4333_p1), [#allocation13], 2048   ;;  %p4334_p6 = pmov %p4333_p1 }
  0xeb   : > { %s4335_s13 = sld [smem:[#allocation25_spill]]  ;;  %s4336_s8 = sld [smem:[#allocation23_spill]] }
  0xec   : > { %3110 = vsyncadd (%p4334_p6), [#allocation13], 4294965248  ;;  %s4337_s10 = sld [smem:[#allocation35_spill]]  ;;  %s4338_s29 = sld [smem:[#allocation36_spill]] }
  0xed   : > { %s4339_s7 = sld [smem:[#allocation38_spill]]  ;;  %s3637_s0 = scalar_lea.vmem [#allocation15], %s2307_s28 }
  0xf1   : > { %p550_p8 = scmp.lt.s32.totalorder %s4335_s13, 1  ;;  %p557_p5 = scmp.lt.s32.totalorder %s4336_s8, 1 }
  0xf2   : > { %p2313_p11 = scmp.ne.s32.totalorder %s4336_s8, 0 }
  0xf3   : > { %s4377_s13 = smov (!%p550_p8, %s4335_s13), 1  ;;  %v2741_v0 = vld [vmem:[#allocation12] sm:$0xff] (!%p2313_p11)   ;;  %v2742_v1 = vld [vmem:[#allocation12 + $0x8] sm:$0xff] (!%p2313_p11)   ;;  %v2743_v2 = vld [vmem:[#allocation12 + $0x10] sm:$0xff] (!%p2313_p11)   ;;  %vm820_vm0 = vcmask (!%p2313_p11), 7168  }
  0xf4   : > { %s3625_s23 = scalar_select %p557_p5, %s4336_s8, 1 }
  0xf5   : > { %s552_s3 = scalar_lea.vmem %s4337_s10, %s4377_s13  ;;  %s555_s5 = scalar_lea.vmem %s4338_s29, %s4377_s13  ;;  %2422 = vmatprep.subr.bf16.mxu0 (!%p2313_p11), %v2741_v0  ;;  %2550 = vmatprep.subr.bf16.mxu1 (!%p2313_p11), %v2741_v0  ;;  %v2744_v3 = vld [vmem:[#allocation12 + $0x18] sm:$0xff] (!%p2313_p11)   ;;  %v566_v4 = vld [vmem:[%s3601_s9] sm:$0xff] (!%p2313_p11)  ;;  %v567_v5 = vld [vmem:[%s3601_s9 + $0x8] sm:$0xff] (!%p2313_p11) }
  0xf6   : > { %s559_s16 = scalar_lea.vmem %s4339_s7, %s3625_s23  ;;  %565 = sbr.rel (%p2313_p11) target bundleno = 505 (0x1f9), region = 84  ;;  %2423 = vmatpush3.bf16.msra.mxu0 (!%p2313_p11), %v2741_v0  ;;  %2558 = vmatpush3.bf16.msra.mxu1 (!%p2313_p11), %v2741_v0  ;;  %v3642_v6 = vld [vmem:[%s552_s3] ss:$0 sm:$0xff] (!%p2313_p11)  ;;  %v575_v11 = vld [vmem:[%s3601_s9 + $0x48] sm:$0xff] (!%p2313_p11)  ;;  %v2747_v22 = vld [vmem:[#allocation12 + $0x30] sm:$0xff] (!%p2313_p11)  }
  0xf7   : > { %2424 = vmatprep.subr.bf16.mxu0 (!%p2313_p11), %v2742_v1  ;;  %2551 = vmatprep.subr.bf16.mxu1 (!%p2313_p11), %v2742_v1  ;;  %v589_v7 = vmul.f32 (!%p2313_p11), %v3642_v6, %v566_v4  ;;  %v590_v8 = vmul.f32 (!%p2313_p11), %v3642_v6, %v567_v5  ;;  %v3646_v9 = vld [vmem:[%s555_s5] ss:$0 sm:$0xff] (!%p2313_p11)  ;;  %v598_v13 = vmul.f32 (!%p2313_p11), %v3642_v6, %v575_v11  ;;  %v2746_v21 = vld [vmem:[#allocation12 + $0x28] sm:$0xff] (!%p2313_p11)   ;;  %v568_v23 = vld [vmem:[%s3601_s9 + $0x10] sm:$0xff] (!%p2313_p11)  ;;  %s4340_s8 = sld [smem:[#allocation40_spill]] (!%p2313_p11) }
  0xf8   : > { %v574_v10 = vld [vmem:[%s3601_s9 + $0x40] sm:$0xff] (!%p2313_p11)  ;;  %v569_v24 = vld [vmem:[%s3601_s9 + $0x18] sm:$0xff] (!%p2313_p11)  ;;  %v576_v25 = vld [vmem:[%s3601_s9 + $0x50] sm:$0xff] (!%p2313_p11)  ;;  %v591_v31 = vmul.f32 (!%p2313_p11), %v3642_v6, %v568_v23 }
  0xf9   : > { %v597_v12 = vmul.f32 (!%p2313_p11), %v3642_v6, %v574_v10  ;;  %v612_v14 = vadd.f32 (!%p2313_p11), %v3646_v9, %v589_v7  ;;  %v613_v15 = vadd.f32 (!%p2313_p11), %v3646_v9, %v590_v8  ;;  %v2745_v16 = vld [vmem:[#allocation12 + $0x20] sm:$0xff] (!%p2313_p11)   ;;  %v621_v18 = vadd.f32 (!%p2313_p11), %v3646_v9, %v598_v13  ;;  %v577_v26 = vld [vmem:[%s3601_s9 + $0x58] sm:$0xff] (!%p2313_p11)  ;;  %v571_v28 = vld [vmem:[%s3601_s9 + $0x28] sm:$0xff] (!%p2313_p11) }
  0xfa   : > { %2425 = vmatpush3.bf16.msra.mxu0 (!%p2313_p11), %v2742_v1  ;;  %2559 = vmatpush3.bf16.msra.mxu1 (!%p2313_p11), %v2742_v1  ;;  %v570_v27 = vld [vmem:[%s3601_s9 + $0x20] sm:$0xff] (!%p2313_p11)  ;;  %v579_v30 = vld [vmem:[%s3601_s9 + $0x68] sm:$0xff] (!%p2313_p11)  ;;  %v592_v32 = vmul.f32 (!%p2313_p11), %v3642_v6, %v569_v24  ;;  %v599_v33 = vmul.f32 (!%p2313_p11), %v3642_v6, %v576_v25  ;;  %v600_v34 = vmul.f32 (!%p2313_p11), %v3642_v6, %v577_v26  ;;  %v2748_v39 = vld [vmem:[#allocation12 + $0x38] sm:$0xff] (!%p2313_p11)  }
  0xfb   : > { %2426 = vmatprep.subr.bf16.mxu0 (!%p2313_p11), %v2743_v2  ;;  %2552 = vmatprep.subr.bf16.mxu1 (!%p2313_p11), %v2743_v2  ;;  %v620_v17 = vadd.f32 (!%p2313_p11), %v3646_v9, %v597_v12  ;;  %v628_v19 = vpack.c.bf16 (!%p2313_p11), %v613_v15, %v612_v14  ;;  %v578_v29 = vld [vmem:[%s3601_s9 + $0x60] sm:$0xff] (!%p2313_p11)  ;;  %v593_v35 = vmul.f32 (!%p2313_p11), %v3642_v6, %v570_v27  ;;  %v572_v45 = vld [vmem:[%s3601_s9 + $0x30] sm:$0xff] (!%p2313_p11)  ;;  %v573_v49 = vld [vmem:[%s3601_s9 + $0x38] sm:$0xff] (!%p2313_p11) }
  0xfc   : > { %v594_v36 = vmul.f32 (!%p2313_p11), %v3642_v6, %v571_v28  ;;  %v601_v37 = vmul.f32 (!%p2313_p11), %v3642_v6, %v578_v29  ;;  %v602_v38 = vmul.f32 (!%p2313_p11), %v3642_v6, %v579_v30  ;;  %v614_v40 = vadd.f32 (!%p2313_p11), %v3646_v9, %v591_v31  ;;  %v580_v50 = vld [vmem:[%s3601_s9 + $0x70] sm:$0xff] (!%p2313_p11)  ;;  %v581_v51 = vld [vmem:[%s3601_s9 + $0x78] sm:$0xff] (!%p2313_p11) }
  0xfd   : > { %v632_v20 = vpack.c.bf16 %v621_v18, %v620_v17  ;;  %2438 = vmatprep.mubr.bf16.mxu0 %v628_v19  ;;  %v615_v41 = vadd.f32 %v3646_v9, %v592_v32  ;;  %v622_v42 = vadd.f32 %v3646_v9, %v599_v33  ;;  %v623_v43 = vadd.f32 %v3646_v9, %v600_v34  ;;  %v2316_v5 = vld [vmem:[%s4340_s8] ss:$0 sm:$0xff] }
  0xfe   : > { %2427 = vmatpush3.bf16.msra.mxu0 %v2743_v2  ;;  %2560 = vmatpush3.bf16.msra.mxu1 %v2743_v2  ;;  %v616_v44 = vadd.f32 %v3646_v9, %v593_v35  ;;  %v617_v46 = vadd.f32 %v3646_v9, %v594_v36  ;;  %v624_v47 = vadd.f32 %v3646_v9, %v601_v37  ;;  %v3176_v2 = vmov -1e+30  }
  0xff   : > { %2428 = vmatprep.subr.bf16.mxu0 %v2744_v3  ;;  %2553 = vmatprep.subr.bf16.mxu1 %v2744_v3  ;;  %v625_v48 = vadd.f32 %v3646_v9, %v602_v38  ;;  %v629_v52 = vpack.c.bf16 %v615_v41, %v614_v40  ;;  %v595_v53 = vmul.f32 %v3642_v6, %v572_v45 }
 0x100   : > { %2446 = vmatprep.mubr.bf16.mxu1 %v632_v20  ;;  %v633_v54 = vpack.c.bf16 %v623_v43, %v622_v42  ;;  %v596_v55 = vmul.f32 %v3642_v6, %v573_v49  ;;  %v603_v56 = vmul.f32 %v3642_v6, %v580_v50  ;;  %v604_v57 = vmul.f32 %v3642_v6, %v581_v51 }
 0x101   : > { %v630_v58 = vpack.c.bf16 %v617_v46, %v616_v44  ;;  %v634_v59 = vpack.c.bf16 %v625_v48, %v624_v47  ;;  %v618_v60 = vadd.f32 %v3646_v9, %v595_v53  ;;  %821 = vst.msk [vmem:[#allocation3] sm:$0xff] %vm820_vm0, %v3176_v2  ;;  %822 = vst.msk [vmem:[#allocation3 + $0x8] sm:$0xff] %vm820_vm0, %v3176_v2 }
 0x102   : > { %2429 = vmatpush3.bf16.msra.mxu0 %v2744_v3  ;;  %2561 = vmatpush3.bf16.msra.mxu1 %v2744_v3  ;;  %v619_v61 = vadd.f32 %v3646_v9, %v596_v55  ;;  %v626_v62 = vadd.f32 %v3646_v9, %v603_v56  ;;  %v627_v63 = vadd.f32 %v3646_v9, %v604_v57  ;;  %v3177_v3 = vmov 0.0  }
 0x103   : > { %2430 = vmatprep.subr.bf16.mxu0 %v2745_v16  ;;  %2554 = vmatprep.subr.bf16.mxu1 %v2745_v16  ;;  %823 = vst.msk [vmem:[#allocation3 + $0x10] sm:$0xff] %vm820_vm0, %v3176_v2  ;;  %824 = vst.msk [vmem:[#allocation3 + $0x18] sm:$0xff] %vm820_vm0, %v3176_v2 }
 0x104   : > { %v631_v0 = vpack.c.bf16 %v619_v61, %v618_v60  ;;  %v635_v1 = vpack.c.bf16 %v627_v63, %v626_v62  ;;  %825 = vst.msk [vmem:[#allocation3 + $0x20] sm:$0xff] %vm820_vm0, %v3176_v2  ;;  %826 = vst.msk [vmem:[#allocation3 + $0x28] sm:$0xff] %vm820_vm0, %v3176_v2 }
 0x105   : > { %827 = vst.msk [vmem:[#allocation3 + $0x30] sm:$0xff] %vm820_vm0, %v3176_v2  ;;  %828 = vst.msk [vmem:[#allocation3 + $0x38] sm:$0xff] %vm820_vm0, %v3176_v2 }
 0x106   : > { %2431 = vmatpush3.bf16.msra.mxu0 %v2745_v16  ;;  %2562 = vmatpush3.bf16.msra.mxu1 %v2745_v16  ;;  %829 = vst.msk [vmem:[#allocation3 + $0x40] sm:$0xff] %vm820_vm0, %v3176_v2  ;;  %830 = vst.msk [vmem:[#allocation3 + $0x48] sm:$0xff] %vm820_vm0, %v3176_v2 }
 0x107   : > { %2432 = vmatprep.subr.bf16.mxu0 %v2746_v21  ;;  %2555 = vmatprep.subr.bf16.mxu1 %v2746_v21  ;;  %831 = vst.msk [vmem:[#allocation3 + $0x50] sm:$0xff] %vm820_vm0, %v3176_v2  ;;  %832 = vst.msk [vmem:[#allocation3 + $0x58] sm:$0xff] %vm820_vm0, %v3176_v2 }
 0x108   : > { %833 = vst.msk [vmem:[#allocation3 + $0x60] sm:$0xff] %vm820_vm0, %v3176_v2  ;;  %834 = vst.msk [vmem:[#allocation3 + $0x68] sm:$0xff] %vm820_vm0, %v3176_v2 }
 0x109   : > { %835 = vst.msk [vmem:[#allocation3 + $0x70] sm:$0xff] %vm820_vm0, %v3176_v2  ;;  %836 = vst.msk [vmem:[#allocation3 + $0x78] sm:$0xff] %vm820_vm0, %v3176_v2 }
 0x10a   : > { %2433 = vmatpush3.bf16.msra.mxu0 %v2746_v21  ;;  %2563 = vmatpush3.bf16.msra.mxu1 %v2746_v21  ;;  %837 = vst.msk [vmem:[#allocation4] sm:$0xff] %vm820_vm0, %v3177_v3  ;;  %838 = vst.msk [vmem:[#allocation4 + $0x8] sm:$0xff] %vm820_vm0, %v3177_v3 }
 0x10b   : > { %2434 = vmatprep.subr.bf16.mxu0 %v2747_v22  ;;  %2556 = vmatprep.subr.bf16.mxu1 %v2747_v22  ;;  %839 = vst.msk [vmem:[#allocation4 + $0x10] sm:$0xff] %vm820_vm0, %v3177_v3  ;;  %840 = vst.msk [vmem:[#allocation4 + $0x18] sm:$0xff] %vm820_vm0, %v3177_v3 }
 0x10c   : > { %841 = vst.msk [vmem:[#allocation4 + $0x20] sm:$0xff] %vm820_vm0, %v3177_v3  ;;  %842 = vst.msk [vmem:[#allocation4 + $0x28] sm:$0xff] %vm820_vm0, %v3177_v3 }
 0x10d   : > { %843 = vst.msk [vmem:[#allocation4 + $0x30] sm:$0xff] %vm820_vm0, %v3177_v3  ;;  %844 = vst.msk [vmem:[#allocation4 + $0x38] sm:$0xff] %vm820_vm0, %v3177_v3 }
 0x10e   : > { %2435 = vmatpush3.bf16.msra.mxu0 %v2747_v22  ;;  %2564 = vmatpush3.bf16.msra.mxu1 %v2747_v22  ;;  %845 = vst.msk [vmem:[#allocation4 + $0x40] sm:$0xff] %vm820_vm0, %v3177_v3  ;;  %846 = vst.msk [vmem:[#allocation4 + $0x48] sm:$0xff] %vm820_vm0, %v3177_v3 }
 0x10f   : > { %2436 = vmatprep.subr.bf16.mxu0 %v2748_v39  ;;  %2557 = vmatprep.subr.bf16.mxu1 %v2748_v39  ;;  %847 = vst.msk [vmem:[#allocation4 + $0x50] sm:$0xff] %vm820_vm0, %v3177_v3  ;;  %848 = vst.msk [vmem:[#allocation4 + $0x58] sm:$0xff] %vm820_vm0, %v3177_v3 }
 0x110   : > { %849 = vst.msk [vmem:[#allocation4 + $0x60] sm:$0xff] %vm820_vm0, %v3177_v3  ;;  %850 = vst.msk [vmem:[#allocation4 + $0x68] sm:$0xff] %vm820_vm0, %v3177_v3 }
 0x111   : > { %851 = vst.msk [vmem:[#allocation4 + $0x70] sm:$0xff] %vm820_vm0, %v3177_v3  ;;  %852 = vst.msk [vmem:[#allocation4 + $0x78] sm:$0xff] %vm820_vm0, %v3177_v3 }
 0x112   : > { %2437 = vmatpush3.bf16.msra.mxu0 %v2748_v39  ;;  %2565 = vmatpush3.bf16.msra.mxu1 %v2748_v39  ;;  %853 = vst [vmem:[#allocation5] sm:$0xff] %v3177_v3  ;;  %854 = vst [vmem:[#allocation5 + $0x8] sm:$0xff] %v3177_v3 }
 0x113   : > { %855 = vst [vmem:[#allocation5 + $0x10] sm:$0xff] %v3177_v3  ;;  %856 = vst [vmem:[#allocation5 + $0x18] sm:$0xff] %v3177_v3 }
 0x114   : > { %857 = vst [vmem:[#allocation5 + $0x20] sm:$0xff] %v3177_v3  ;;  %858 = vst [vmem:[#allocation5 + $0x28] sm:$0xff] %v3177_v3 }
 0x115   : > { %2439 = vmatmul.mubr.bf16.vlgmr.msra.gmra.mrb[0].mxu0 %v629_v52  ;;  %2447 = vmatmul.mubr.bf16.vlgmr.msra.gmra.mrb[0].mxu1 %v633_v54  ;;  %859 = vst [vmem:[#allocation5 + $0x30] sm:$0xff] %v3177_v3  ;;  %860 = vst [vmem:[#allocation5 + $0x38] sm:$0xff] %v3177_v3 }
 0x116   : > { %2442 = vmatprep.mubr.bf16.mxu0 %v630_v58  ;;  %2450 = vmatprep.mubr.bf16.mxu1 %v634_v59  ;;  %861 = vst [vmem:[#allocation5 + $0x40] sm:$0xff] %v3177_v3  ;;  %862 = vst [vmem:[#allocation5 + $0x48] sm:$0xff] %v3177_v3 }
 0x117   : > { %863 = vst [vmem:[#allocation5 + $0x50] sm:$0xff] %v3177_v3  ;;  %864 = vst [vmem:[#allocation5 + $0x58] sm:$0xff] %v3177_v3 }
 0x118   : > { %865 = vst [vmem:[#allocation5 + $0x60] sm:$0xff] %v3177_v3  ;;  %866 = vst [vmem:[#allocation5 + $0x68] sm:$0xff] %v3177_v3 }
 0x119   : > { %867 = vst [vmem:[#allocation5 + $0x70] sm:$0xff] %v3177_v3  ;;  %868 = vst [vmem:[#allocation5 + $0x78] sm:$0xff] %v3177_v3 }
 0x11d   : > { %2443 = vmatmul.mubr.bf16.gmra.mrb[4].mxu0 %v631_v0  ;;  %2451 = vmatmul.mubr.bf16.gmra.mrb[4].mxu1 %v635_v1 }
 0x1e8   : > { %v2440_v4 = vpop.f32.mrb[0].mxu0  ;;  %v2448_v6 = vpop.f32.mrb[0].mxu1 }
 0x1e9   : > { %v741_v7 = vpop.f32.mrb[1].mxu0  ;;  %v773_v8 = vpop.f32.mrb[1].mxu1  ;;  %v750_v11 = vadd.f32 %v2440_v4, %v2316_v5  ;;  %v782_v12 = vadd.f32 %v2448_v6, %v2316_v5 }
 0x1ea   : > { %v2441_v9 = vpop.f32.mrb[2].mxu0  ;;  %v2449_v10 = vpop.f32.mrb[2].mxu1  ;;  %v742_v17 = vadd.f32 %v2316_v5, %v741_v7  ;;  %v774_v18 = vadd.f32 %v2316_v5, %v773_v8 }
 0x1eb   : > { %v753_v13 = vadd.f32 %v2441_v9, %v2316_v5  ;;  %v785_v14 = vadd.f32 %v2449_v10, %v2316_v5  ;;  %v744_v15 = vpop.f32.mrb[3].mxu0  ;;  %v776_v16 = vpop.f32.mrb[3].mxu1 }
 0x1ec   : > { %v745_v19 = vadd.f32 %v2316_v5, %v744_v15  ;;  %v777_v20 = vadd.f32 %v2316_v5, %v776_v16 }
 0x1ed   : > { %v805_v21 = vpack.c.bf16 %v753_v13, %v750_v11  ;;  %v809_v22 = vpack.c.bf16 %v785_v14, %v782_v12 }
 0x1ee   : > { %v804_v23 = vpack.c.bf16 %v745_v19, %v742_v17  ;;  %v808_v24 = vpack.c.bf16 %v777_v20, %v774_v18 }
 0x1ef   : > { %813 = vst [vmem:[#allocation2 + $0x8] sm:$0xff] %v805_v21  ;;  %817 = vst [vmem:[#allocation2 + $0x28] sm:$0xff] %v809_v22 }
 0x1f0   : > { %812 = vst [vmem:[#allocation2] sm:$0xff] %v804_v23  ;;  %816 = vst [vmem:[#allocation2 + $0x20] sm:$0xff] %v808_v24  ;;  %v2444_v25 = vpop.f32.mrb[4].mxu0  ;;  %v2452_v26 = vpop.f32.mrb[4].mxu1 }
 0x1f1   : > { %v757_v27 = vpop.f32.mrb[5].mxu0  ;;  %v789_v28 = vpop.f32.mrb[5].mxu1  ;;  %v766_v31 = vadd.f32 %v2444_v25, %v2316_v5  ;;  %v798_v32 = vadd.f32 %v2452_v26, %v2316_v5 }
 0x1f2   : > { %v2445_v29 = vpop.f32.mrb[6].mxu0  ;;  %v2453_v30 = vpop.f32.mrb[6].mxu1  ;;  %v758_v37 = vadd.f32 %v2316_v5, %v757_v27  ;;  %v790_v38 = vadd.f32 %v2316_v5, %v789_v28 }
 0x1f3   : > { %v769_v33 = vadd.f32 %v2445_v29, %v2316_v5  ;;  %v801_v34 = vadd.f32 %v2453_v30, %v2316_v5  ;;  %v760_v35 = vpop.f32.mrb[7].mxu0  ;;  %v792_v36 = vpop.f32.mrb[7].mxu1 }
 0x1f4   : > { %v761_v39 = vadd.f32 %v2316_v5, %v760_v35  ;;  %v793_v40 = vadd.f32 %v2316_v5, %v792_v36 }
 0x1f5   : > { %v807_v41 = vpack.c.bf16 %v769_v33, %v766_v31  ;;  %v811_v42 = vpack.c.bf16 %v801_v34, %v798_v32 }
 0x1f6   : > { %v806_v43 = vpack.c.bf16 %v761_v39, %v758_v37  ;;  %v810_v44 = vpack.c.bf16 %v793_v40, %v790_v38 }
 0x1f7   : > { %815 = vst [vmem:[#allocation2 + $0x18] sm:$0xff] %v807_v41  ;;  %819 = vst [vmem:[#allocation2 + $0x38] sm:$0xff] %v811_v42 }
 0x1f8   : > { %814 = vst [vmem:[#allocation2 + $0x10] sm:$0xff] %v806_v43  ;;  %818 = vst [vmem:[#allocation2 + $0x30] sm:$0xff] %v810_v44 }
 0x1f9 PF: > { %v2751_v45 = vld [vmem:[%s3609_s21] sm:$0xff]   ;;  %v2752_v46 = vld [vmem:[%s3609_s21 + $0x8] sm:$0xff]   ;;  %v2753_v47 = vld [vmem:[%s3609_s21 + $0x10] sm:$0xff]   ;;  %v3178_v18 = vmov 0   ;;  %vm1365_vm1 = vcmask 7168  }
 0x1fa   : > { %2454 = vmatprep.subr.bf16.mxu0 %v2751_v45  ;;  %v2754_v48 = vld [vmem:[%s3609_s21 + $0x18] sm:$0xff]   ;;  %v869_v49 = vld [vmem:[#allocation2] sm:$0xff]  ;;  %v2756_v51 = vld [vmem:[%s3609_s21 + $0x28] sm:$0xff]   ;;  %2750 = vset.pattern.permute.xlu1 %v3178_v18 }
 0x1fb   : > { %2455 = vmatpush3.bf16.msra.mxu0 %v2751_v45  ;;  %2470 = vmatprep.mubr.bf16.mxu0 %v869_v49  ;;  %v2755_v50 = vld [vmem:[%s3609_s21 + $0x20] sm:$0xff]   ;;  %v2757_v52 = vld [vmem:[%s3609_s21 + $0x30] sm:$0xff]   ;;  %v2758_v53 = vld [vmem:[%s3609_s21 + $0x38] sm:$0xff]  }
 0x1fc   : > { %2456 = vmatprep.subr.bf16.mxu0 %v2752_v46  ;;  %v870_v54 = vld [vmem:[#allocation2 + $0x8] sm:$0xff]  ;;  %v873_v57 = vld [vmem:[#allocation2 + $0x20] sm:$0xff]  ;;  %2749 = vset.pattern.permute.xlu0 %v3178_v18  ;;  %v3790_v33 = vld [vmem:[#allocation3 + $0x10] sm:$0xff] }
 0x1fd   : > { %v874_v58 = vld [vmem:[#allocation2 + $0x28] sm:$0xff]  ;;  %v2325_v61 = vld [vmem:[%s559_s16] ss:$0 sm:$0xff]  ;;  %v3800_v39 = vld [vmem:[#allocation3 + $0x18] sm:$0xff] }
 0x1fe   : > { %v872_v56 = vld [vmem:[#allocation2 + $0x18] sm:$0xff]  ;;  %v2759_v31 = vld [vmem:[%s3615_s6] sm:$0xff]   ;;  %v2760_v32 = vld [vmem:[%s3615_s6 + $0x8] sm:$0xff]  }
 0x1ff   : > { %2457 = vmatpush3.bf16.msra.mxu0 %v2752_v46  ;;  %v871_v55 = vld [vmem:[#allocation2 + $0x10] sm:$0xff]  ;;  %v876_v60 = vld [vmem:[#allocation2 + $0x38] sm:$0xff]  ;;  %2486 = vmatprep.subr.bf16.mxu1 %v2759_v31  ;;  %v3792_v34 = vld [vmem:[#allocation3] sm:$0xff] }
 0x200   : > { %2458 = vmatprep.subr.bf16.mxu0 %v2753_v47  ;;  %v875_v59 = vld [vmem:[#allocation2 + $0x30] sm:$0xff]  ;;  %2487 = vmatpush3.bf16.msra.mxu1 %v2759_v31  ;;  %v3805_v40 = vld [vmem:[#allocation3 + $0x8] sm:$0xff]  ;;  %v3820_v46 = vld [vmem:[#allocation3 + $0x20] sm:$0xff] }
 0x201   : > { %2488 = vmatprep.subr.bf16.mxu1 %v2760_v32  ;;  %v2761_v41 = vld [vmem:[%s3615_s6 + $0x10] sm:$0xff]  }
 0x203   : > { %2459 = vmatpush3.bf16.msra.mxu0 %v2753_v47  ;;  %v2762_v47 = vld [vmem:[%s3615_s6 + $0x18] sm:$0xff]  }
 0x204   : > { %2460 = vmatprep.subr.bf16.mxu0 %v2754_v48  ;;  %2489 = vmatpush3.bf16.msra.mxu1 %v2760_v32 }
 0x205   : > { %2490 = vmatprep.subr.bf16.mxu1 %v2761_v41 }
 0x207   : > { %2461 = vmatpush3.bf16.msra.mxu0 %v2754_v48  ;;  %v3825_v48 = vld [vmem:[#allocation3 + $0x38] sm:$0xff] }
 0x208   : > { %2462 = vmatprep.subr.bf16.mxu0 %v2755_v50  ;;  %2491 = vmatpush3.bf16.msra.mxu1 %v2761_v41  ;;  %v1058_v41 = vld [vmem:[#allocation3 + $0x68] sm:$0xff] }
 0x209   : > { %2492 = vmatprep.subr.bf16.mxu1 %v2762_v47 }
 0x20b   : > { %2463 = vmatpush3.bf16.msra.mxu0 %v2755_v50 }
 0x20c   : > { %2464 = vmatprep.subr.bf16.mxu0 %v2756_v51  ;;  %2493 = vmatpush3.bf16.msra.mxu1 %v2762_v47 }
 0x20f   : > { %2465 = vmatpush3.bf16.msra.mxu0 %v2756_v51 }
 0x210   : > { %2466 = vmatprep.subr.bf16.mxu0 %v2757_v52 }
 0x213   : > { %2467 = vmatpush3.bf16.msra.mxu0 %v2757_v52 }
 0x214   : > { %2468 = vmatprep.subr.bf16.mxu0 %v2758_v53 }
 0x217   : > { %2469 = vmatpush3.bf16.msra.mxu0 %v2758_v53  ;;  %v3834_v53 = vld [vmem:[#allocation3 + $0x30] sm:$0xff] }
 0x21a   : > { %2471 = vmatmul.mubr.bf16.vlgmr.msra.gmra.mrb[0].mxu0 %v870_v54  ;;  %v2763_v54 = vld [vmem:[%s3615_s6 + $0x20] sm:$0xff]  }
 0x21b   : > { %2474 = vmatprep.mubr.bf16.mxu0 %v871_v55  ;;  %v3839_v55 = vld [vmem:[#allocation3 + $0x28] sm:$0xff]  ;;  %2494 = vmatprep.subr.bf16.mxu1 %v2763_v54 }
 0x21c   : > { %2495 = vmatpush3.bf16.msra.mxu1 %v2763_v54 }
 0x222   : > { %2475 = vmatmul.mubr.bf16.gmra.mrb[4].mxu0 %v872_v56 }
 0x223   : > { %2478 = vmatprep.mubr.bf16.mxu0 %v873_v57 }
 0x22a   : > { %2479 = vmatmul.mubr.bf16.gmra.mrb[8].mxu0 %v874_v58 }
 0x22b   : > { %2482 = vmatprep.mubr.bf16.mxu0 %v875_v59 }
 0x232   : > { %2483 = vmatmul.mubr.bf16.gmra.mrb[12].mxu0 %v876_v60  ;;  %v3849_v60 = vld [vmem:[#allocation3 + $0x40] sm:$0xff] }
 0x2ed   : > { %v2472_v62 = vpop.f32.mrb[0].mxu0 }
 0x2ee   : > { %v3740_v63 = vadd.f32 %v2472_v62, %v2325_v61  ;;  %v982_v0 = vpop.f32.mrb[1].mxu0  ;;  %v3855_v62 = vld [vmem:[#allocation3 + $0x58] sm:$0xff] }
 0x2ef   : > { %v3742_v1 = vadd.f32 %v2325_v61, %v982_v0  ;;  %v2473_v2 = vpop.f32.mrb[2].mxu0 }
 0x2f0   : > { %1065 = vmax.xlane.f32.xlu1 %v3740_v63  ;;  %v985_v3 = vpop.f32.mrb[3].mxu0  ;;  %v3746_v4 = vadd.f32 %v2473_v2, %v2325_v61 }
 0x2f1   : > { %1061 = vmax.xlane.f32.xlu0 %v3742_v1  ;;  %v3748_v5 = vadd.f32 %v2325_v61, %v985_v3 }
 0x2f4   : > { %1067 = vmax.xlane.f32.xlu1 %v3746_v4 }
 0x2f5   : > { %v2476_v6 = vpop.f32.mrb[4].mxu0  ;;  %1063 = vmax.xlane.f32.xlu0 %v3748_v5 }
 0x2f6   : > { %v998_v7 = vpop.f32.mrb[5].mxu0  ;;  %v3758_v12 = vadd.f32 %v2476_v6, %v2325_v61 }
 0x2f7   : > { %v3752_v8 = vadd.f32 %v2325_v61, %v998_v7  ;;  %v2477_v9 = vpop.f32.mrb[6].mxu0  ;;  %v3865_v7 = vld [vmem:[#allocation3 + $0x50] sm:$0xff] }
 0x2f8   : > { %v3754_v10 = vadd.f32 %v2477_v9, %v2325_v61  ;;  %v1001_v11 = vpop.f32.mrb[7].mxu0  ;;  %v2765_v9 = vld [vmem:[%s3615_s6 + $0x30] sm:$0xff]  }
 0x2f9   : > { %1069 = vmax.xlane.f32.xlu0 %v3752_v8  ;;  %v3760_v13 = vadd.f32 %v2325_v61, %v1001_v11  ;;  %v3871_v11 = vld [vmem:[#allocation3 + $0x48] sm:$0xff] }
 0x2fa   : > { %1075 = vmax.xlane.f32.xlu1 %v3754_v10 }
 0x2fd   : > { %v2480_v14 = vpop.f32.mrb[8].mxu0  ;;  %1073 = vmax.xlane.f32.xlu0 %v3758_v12 }
 0x2fe   : > { %v1014_v15 = vpop.f32.mrb[9].mxu0  ;;  %1071 = vmax.xlane.f32.xlu1 %v3760_v13  ;;  %v3768_v21 = vadd.f32 %v2480_v14, %v2325_v61 }
 0x2ff   : > { %v3764_v16 = vadd.f32 %v2325_v61, %v1014_v15  ;;  %v2481_v17 = vpop.f32.mrb[10].mxu0 }
 0x300   : > { %v3766_v19 = vadd.f32 %v2481_v17, %v2325_v61  ;;  %v1017_v20 = vpop.f32.mrb[11].mxu0 }
 0x301   : > { %1077 = vmax.xlane.f32.xlu0 %v3764_v16  ;;  %v3772_v22 = vadd.f32 %v2325_v61, %v1017_v20 }
 0x302   : > { %1083 = vmax.xlane.f32.xlu1 %v3766_v19 }
 0x305   : > { %v2484_v23 = vpop.f32.mrb[12].mxu0  ;;  %1081 = vmax.xlane.f32.xlu0 %v3768_v21 }
 0x306   : > { %v1030_v24 = vpop.f32.mrb[13].mxu0  ;;  %1079 = vmax.xlane.f32.xlu1 %v3772_v22  ;;  %v3780_v29 = vadd.f32 %v2484_v23, %v2325_v61  ;;  %v3883_v23 = vld [vmem:[#allocation3 + $0x60] sm:$0xff] }
 0x307   : > { %v3776_v25 = vadd.f32 %v2325_v61, %v1030_v24  ;;  %v2485_v26 = vpop.f32.mrb[14].mxu0  ;;  %v2766_v24 = vld [vmem:[%s3615_s6 + $0x38] sm:$0xff]  }
 0x308   : > { %v3778_v27 = vadd.f32 %v2485_v26, %v2325_v61  ;;  %v1033_v28 = vpop.f32.mrb[15].mxu0  ;;  %v3889_v26 = vld [vmem:[#allocation3 + $0x78] sm:$0xff] }
 0x309   : > { %1085 = vmax.xlane.f32.xlu0 %v3776_v25  ;;  %v3784_v30 = vadd.f32 %v2325_v61, %v1033_v28  ;;  %v2764_v61 = vld [vmem:[%s3615_s6 + $0x28] sm:$0xff]   ;;  %s4342_s6 = sld [smem:[#allocation23_spill]] }
 0x30a   : > { %1091 = vmax.xlane.f32.xlu1 %v3778_v27  ;;  %2496 = vmatprep.subr.bf16.mxu1 %v2764_v61 }
 0x30b   : > { %2497 = vmatpush3.bf16.msra.mxu1 %v2764_v61 }
 0x30c   : > { %2498 = vmatprep.subr.bf16.mxu1 %v2765_v9 }
 0x30d   : > { %1089 = vmax.xlane.f32.xlu0 %v3780_v29 }
 0x30e   : > { %1087 = vmax.xlane.f32.xlu1 %v3784_v30 }
 0x30f   : > { %2499 = vmatpush3.bf16.msra.mxu1 %v2765_v9  ;;  %p2342_p12 = scmp.ne.s32.totalorder %s4342_s6, 1 }
 0x310   : > { %2500 = vmatprep.subr.bf16.mxu1 %v2766_v24  ;;  %s4343_s3 = sld [smem:[#allocation42_spill]] (!%p2342_p12) }
 0x313   : > { %2501 = vmatpush3.bf16.msra.mxu1 %v2766_v24 }
 0x37d   : > { %v1066_v35 = vpop.xlane.xlu1 %1065 }
 0x37e   : > { %v3795_v36 = vmax.f32 %v3790_v33, %v1066_v35  ;;  %v1062_v37 = vpop.xlane.xlu0 %1061 }
 0x37f   : > { %v3798_v38 = vmax.f32 %v3792_v34, %v1062_v37 }
 0x380   : > { %1697 = vst.msk [vmem:[#allocation3 + $0x10] sm:$0xff] %vm1365_vm1, %v3795_v36  ;;  %1169 = vperm.xlu1 %2750, %v3795_v36  }
 0x381   : > { %1695 = vst.msk [vmem:[#allocation3] sm:$0xff] %vm1365_vm1, %v3798_v38  ;;  %v1068_v42 = vpop.xlane.xlu1 %1067  ;;  %1159 = vperm.xlu0 %2749, %v3798_v38   ;;  %v1109_v15 = vsub.f32 %v3792_v34, %v3798_v38  ;;  %v3902_v38 = vld [vmem:[#allocation3 + $0x70] sm:$0xff] }
 0x382   : > { %v3812_v43 = vmax.f32 %v3800_v39, %v1068_v42  ;;  %v1064_v44 = vpop.xlane.xlu0 %1063 }
 0x383   : > { %v3815_v45 = vmax.f32 %v3805_v40, %v1064_v44  ;;  %v1125_v31 = vmul.f32 1.442695, %v1109_v15 }
 0x384   : > { %1698 = vst.msk [vmem:[#allocation3 + $0x18] sm:$0xff] %vm1365_vm1, %v3812_v43  ;;  %1174 = vperm.xlu1 %2750, %v3812_v43   ;;  %v1112_v32 = vsub.f32 %v3800_v39, %v3812_v43 }
 0x385   : > { %1696 = vst.msk [vmem:[#allocation3 + $0x8] sm:$0xff] %vm1365_vm1, %v3815_v45  ;;  %v1110_v42 = vsub.f32 %v3805_v40, %v3815_v45  ;;  %2767 = vpow2.f32 %v1125_v31 }
 0x386   : > { %v1070_v49 = vpop.xlane.xlu0 %1069  ;;  %v1131_v44 = vmul.f32 1.442695, %v1112_v32 }
 0x387   : > { %v3828_v50 = vmax.f32 %v3820_v46, %v1070_v49  ;;  %v1076_v51 = vpop.xlane.xlu1 %1075 }
 0x388   : > { %v3831_v52 = vmax.f32 %v3825_v48, %v1076_v51  ;;  %1164 = vperm.xlu1 %2750, %v3815_v45   ;;  %v1111_v45 = vsub.f32 %v3790_v33, %v3795_v36  ;;  %2769 = vpow2.f32 %v1131_v44 }
 0x389   : > { %1699 = vst.msk [vmem:[#allocation3 + $0x20] sm:$0xff] %vm1365_vm1, %v3828_v50  ;;  %v1113_v61 = vsub.f32 %v3820_v46, %v3828_v50 }
 0x38a   : > { %1702 = vst.msk [vmem:[#allocation3 + $0x38] sm:$0xff] %vm1365_vm1, %v3831_v52  ;;  %v1074_v56 = vpop.xlane.xlu0 %1073 }
 0x38b   : > { %v3844_v57 = vmax.f32 %v3834_v53, %v1074_v56  ;;  %v1072_v58 = vpop.xlane.xlu1 %1071  ;;  %v1127_v56 = vmul.f32 1.442695, %v1110_v42 }
 0x38c   : > { %v3847_v59 = vmax.f32 %v3839_v55, %v1072_v58 }
 0x38d   : > { %1701 = vst.msk [vmem:[#allocation3 + $0x30] sm:$0xff] %vm1365_vm1, %v3844_v57  ;;  %1189 = vperm.xlu1 %2750, %v3844_v57   ;;  %2771 = vpow2.f32 %v1127_v56 }
 0x38e   : > { %1700 = vst.msk [vmem:[#allocation3 + $0x28] sm:$0xff] %vm1365_vm1, %v3847_v59  ;;  %v1078_v0 = vpop.xlane.xlu0 %1077  ;;  %v1114_v47 = vsub.f32 %v3839_v55, %v3847_v59  ;;  %v1116_v55 = vsub.f32 %v3825_v48, %v3831_v52  ;;  %v1133_v48 = vmul.f32 1.442695, %v1113_v61 }
 0x38f   : > { %v1084_v2 = vpop.xlane.xlu1 %1083  ;;  %v3860_v3 = vmax.f32 %v3849_v60, %v1078_v0  ;;  %v3935_v36 = vpop.eup %2767 }
 0x390   : > { %v3863_v6 = vmax.f32 %v3855_v62, %v1084_v2  ;;  %v1135_v58 = vmul.f32 1.442695, %v1114_v47  ;;  %v1139_v0 = vmul.f32 1.442695, %v1116_v55 }
 0x391   : > { %1703 = vst.msk [vmem:[#allocation3 + $0x40] sm:$0xff] %vm1365_vm1, %v3860_v3  ;;  %1179 = vperm.xlu1 %2750, %v3828_v50  }
 0x392   : > { %1706 = vst.msk [vmem:[#allocation3 + $0x58] sm:$0xff] %vm1365_vm1, %v3863_v6  ;;  %v1082_v14 = vpop.xlane.xlu0 %1081  ;;  %2773 = vpow2.f32 %v1135_v58  ;;  %v1120_v33 = vsub.f32 %v3855_v62, %v3863_v6  ;;  %v3943_v2 = vpop.eup %2769 }
 0x393   : > { %v1080_v17 = vpop.xlane.xlu1 %1079  ;;  %v3878_v18 = vmax.f32 %v3865_v7, %v1082_v14 }
 0x394   : > { %v3881_v20 = vmax.f32 %v3871_v11, %v1080_v17  ;;  %v1147_v46 = vmul.f32 1.442695, %v1120_v33 }
 0x395   : > { %1705 = vst.msk [vmem:[#allocation3 + $0x50] sm:$0xff] %vm1365_vm1, %v3878_v18  ;;  %1184 = vperm.xlu1 %2750, %v3847_v59   ;;  %v1129_v59 = vmul.f32 1.442695, %v1111_v45 }
 0x396   : > { %1704 = vst.msk [vmem:[#allocation3 + $0x48] sm:$0xff] %vm1365_vm1, %v3881_v20  ;;  %1204 = vperm.xlu0 %2749, %v3881_v20   ;;  %v1086_v28 = vpop.xlane.xlu0 %1085  ;;  %v1118_v50 = vsub.f32 %v3871_v11, %v3881_v20  ;;  %v1117_v11 = vsub.f32 %v3849_v60, %v3860_v3 }
 0x397   : > { %v1092_v34 = vpop.xlane.xlu1 %1091  ;;  %v3897_v35 = vmax.f32 %v3883_v23, %v1086_v28  ;;  %2775 = vpow2.f32 %v1129_v59  ;;  %v3949_v9 = vpop.eup %2771 }
 0x398   : > { %v3900_v37 = vmax.f32 %v3889_v26, %v1092_v34  ;;  %2777 = vpow2.f32 %v1139_v0  ;;  %v1141_v20 = vmul.f32 1.442695, %v1117_v11 }
 0x399   : > { %1707 = vst.msk [vmem:[#allocation3 + $0x60] sm:$0xff] %vm1365_vm1, %v3897_v35  ;;  %1194 = vperm.xlu1 %2750, %v3831_v52   ;;  %v1115_v52 = vsub.f32 %v3834_v53, %v3844_v57  ;;  %2779 = vpow2.f32 %v1133_v48  ;;  %v1143_v53 = vmul.f32 1.442695, %v1118_v50  ;;  %v1121_v24 = vsub.f32 %v3883_v23, %v3897_v35 }
 0x39a   : > { %v1124_v39 = vsub.f32 %v3889_v26, %v3900_v37  ;;  %1710 = vst.msk [vmem:[#allocation3 + $0x78] sm:$0xff] %vm1365_vm1, %v3900_v37  ;;  %1214 = vperm.xlu0 %2749, %v3863_v6   ;;  %v1090_v43 = vpop.xlane.xlu0 %1089  ;;  %v1119_v6 = vsub.f32 %v3865_v7, %v3878_v18  ;;  %2781 = vpow2.f32 %v1147_v46 }
 0x39b   : > { %v1088_v49 = vpop.xlane.xlu1 %1087  ;;  %v3917_v51 = vmax.f32 %v3902_v38, %v1090_v43  ;;  %v1137_v62 = vmul.f32 1.442695, %v1115_v52  ;;  %v1149_v28 = vmul.f32 1.442695, %v1121_v24 }
 0x39c   : > { %v1106_v54 = vmax.f32 %v1058_v41, %v1088_v49  ;;  %v3951_v14 = vpop.eup %2773  ;;  %v1145_v15 = vmul.f32 1.442695, %v1119_v6 }
 0x39d   : > { %v1123_v40 = vsub.f32 %v3902_v38, %v3917_v51  ;;  %1709 = vst.msk [vmem:[#allocation3 + $0x70] sm:$0xff] %vm1365_vm1, %v3917_v51  ;;  %1199 = vperm.xlu1 %2750, %v3860_v3   ;;  %2783 = vpow2.f32 %v1137_v62 }
 0x39e   : > { %1708 = vst.msk [vmem:[#allocation3 + $0x68] sm:$0xff] %vm1365_vm1, %v1106_v54  ;;  %1224 = vperm.xlu0 %2749, %v1106_v54   ;;  %v1122_v57 = vsub.f32 %v1058_v41, %v1106_v54  ;;  %2785 = vpow2.f32 %v1143_v53 }
 0x39f   : > { %2787 = vpow2.f32 %v1145_v15 }
 0x3a0   : > { %v1151_v7 = vmul.f32 1.442695, %v1122_v57 }
 0x3a1   : > { %1209 = vperm.xlu1 %2750, %v3878_v18   ;;  %v3957_v17 = vpop.eup %2775 }
 0x3a2   : > { %1234 = vperm.xlu0 %2749, %v3900_v37   ;;  %v3959_v18 = vpop.eup %2777  ;;  %2789 = vpow2.f32 %v1151_v7 }
 0x3a3   : > { %v3965_v60 = vpop.eup %2779  ;;  %2791 = vpow2.f32 %v1141_v20 }
 0x3a4   : > { %v3967_v3 = vpop.eup %2781  ;;  %2793 = vpow2.f32 %v1149_v28 }
 0x3a5   : > { %1219 = vperm.xlu1 %2750, %v3897_v35  }
 0x3a6   : > { %1400 = vperm.xlu0 %2749, %v3935_v36  }
 0x3a7   : > { %v3971_v31 = vpop.eup %2783 }
 0x3a8   : > { %v3973_v32 = vpop.eup %2785 }
 0x3a9   : > { %1229 = vperm.xlu1 %2750, %v3917_v51   ;;  %v3977_v23 = vpop.eup %2787 }
 0x3aa   : > { %1415 = vperm.xlu0 %2749, %v3943_v2  }
 0x3ac   : > { %v3979_v34 = vpop.eup %2789 }
 0x3ad   : > { %1405 = vperm.xlu1 %2750, %v3949_v9   ;;  %v3983_v35 = vpop.eup %2791 }
 0x3ae   : > { %1425 = vperm.xlu0 %2749, %v3951_v14   ;;  %v3986_v41 = vpop.eup %2793 }
 0x3b1   : > { %1410 = vperm.xlu1 %2750, %v3957_v17  }
 0x3b2   : > { %1435 = vperm.xlu0 %2749, %v3959_v18  }
 0x3b5   : > { %1420 = vperm.xlu1 %2750, %v3965_v60  }
 0x3b6   : > { %1455 = vperm.xlu0 %2749, %v3967_v3  }
 0x3b9   : > { %1430 = vperm.xlu1 %2750, %v3971_v31  }
 0x3ba   : > { %1445 = vperm.xlu0 %2749, %v3973_v32  }
 0x3bd   : > { %1450 = vperm.xlu1 %2750, %v3977_v23  }
 0x3be   : > { %1465 = vperm.xlu0 %2749, %v3979_v34  }
 0x3c1   : > { %1440 = vperm.xlu1 %2750, %v3983_v35  }
 0x3c5   : > { %1460 = vperm.xlu1 %2750, %v3986_v41  }
 0x3ff   : > { %v1170_v42 = vpop.permute.xlu1 %1169 }
 0x400   : > { %v1239_v43 = vsub.f32 %v3740_v63, %v1170_v42  ;;  %v1160_v44 = vpop.permute.xlu0 %1159 }
 0x401   : > { %v1237_v47 = vsub.f32 %v3742_v1, %v1160_v44 }
 0x402   : > { %v1257_v49 = vmul.f32 1.442695, %v1239_v43 }
 0x403   : > { %v1253_v54 = vmul.f32 1.442695, %v1237_v47  ;;  %v1175_v45 = vpop.permute.xlu1 %1174 }
 0x404   : > { %2795 = vpow2.f32 %v1257_v49  ;;  %v1240_v56 = vsub.f32 %v3746_v4, %v1175_v45 }
 0x405   : > { %2797 = vpow2.f32 %v1253_v54 }
 0x406   : > { %v1259_v55 = vmul.f32 1.442695, %v1240_v56 }
 0x407   : > { %v1165_v58 = vpop.permute.xlu1 %1164 }
 0x408   : > { %2799 = vpow2.f32 %v1259_v55  ;;  %v1238_v59 = vsub.f32 %v3748_v5, %v1165_v58 }
 0x40a   : > { %v1255_v61 = vmul.f32 1.442695, %v1238_v59 }
 0x40c   : > { %2801 = vpow2.f32 %v1255_v61  ;;  %v1190_v0 = vpop.permute.xlu1 %1189 }
 0x40d   : > { %v1243_v63 = vsub.f32 %v3758_v12, %v1190_v0 }
 0x40e   : > { %v2796_v33 = vpop.eup %2795 }
 0x40f   : > { %v2798_v48 = vpop.eup %2797  ;;  %v1265_v1 = vmul.f32 1.442695, %v1243_v63  ;;  %1321 = vadd.xlane.f32.xlu0 %v2796_v33 }
 0x410   : > { %v1180_v52 = vpop.permute.xlu1 %1179  ;;  %1317 = vadd.xlane.f32.xlu1 %v2798_v48 }
 0x411   : > { %2803 = vpow2.f32 %v1265_v1  ;;  %v1241_v4 = vsub.f32 %v3752_v8, %v1180_v52 }
 0x412   : > { %v2800_v46 = vpop.eup %2799 }
 0x413   : > { %v1261_v50 = vmul.f32 1.442695, %v1241_v4  ;;  %v1495_v7 = vpack.c.bf16 %v2800_v46, %v2796_v33 }
 0x414   : > { %v1185_v62 = vpop.permute.xlu1 %1184  ;;  %1323 = vadd.xlane.f32.xlu1 %v2800_v46 }
 0x415   : > { %2805 = vpow2.f32 %v1261_v50  ;;  %v1242_v5 = vsub.f32 %v3760_v13, %v1185_v62  ;;  %v1205_v6 = vpop.permute.xlu0 %1204 }
 0x416   : > { %v2802_v53 = vpop.eup %2801  ;;  %v1246_v11 = vsub.f32 %v3772_v22, %v1205_v6 }
 0x417   : > { %v1263_v57 = vmul.f32 1.442695, %v1242_v5  ;;  %1319 = vadd.xlane.f32.xlu0 %v2802_v53  ;;  %v1494_v12 = vpack.c.bf16 %v2802_v53, %v2798_v48 }
 0x418   : > { %v1195_v15 = vpop.permute.xlu1 %1194  ;;  %v1271_v42 = vmul.f32 1.442695, %v1246_v11 }
 0x419   : > { %2807 = vpow2.f32 %v1263_v57  ;;  %v1244_v20 = vsub.f32 %v3754_v10, %v1195_v15  ;;  %2502 = vmatprep.mubr.bf16.mxu1 %v1494_v12  ;;  %v1215_v8 = vpop.permute.xlu0 %1214  ;;  %v1153_v15 = vmul.f32 1.442695, %v1123_v40 }
 0x41a   : > { %2503 = vmatmul.mubr.bf16.vlgmr.msra.gmra.mrb[0].mxu1 %v1495_v7  ;;  %v1248_v13 = vsub.f32 %v3766_v19, %v1215_v8  ;;  %v1155_v7 = vmul.f32 1.442695, %v1124_v39 }
 0x41b   : > { %v2804_v24 = vpop.eup %2803  ;;  %v1267_v28 = vmul.f32 1.442695, %v1244_v20 }
 0x41c   : > { %1329 = vadd.xlane.f32.xlu0 %v2804_v24  ;;  %v1200_v43 = vpop.permute.xlu1 %1199  ;;  %v1275_v54 = vmul.f32 1.442695, %v1248_v13 }
 0x41d   : > { %2809 = vpow2.f32 %v1267_v28  ;;  %v1245_v44 = vsub.f32 %v3764_v16, %v1200_v43  ;;  %v1225_v47 = vpop.permute.xlu0 %1224 }
 0x41e   : > { %2811 = vpow2.f32 %v1271_v42  ;;  %v1250_v10 = vsub.f32 %v3784_v30, %v1225_v47 }
 0x41f   : > { %v2806_v22 = vpop.eup %2805  ;;  %v1269_v49 = vmul.f32 1.442695, %v1245_v44 }
 0x420   : > { %1325 = vadd.xlane.f32.xlu0 %v2806_v22  ;;  %v1210_v45 = vpop.permute.xlu1 %1209  ;;  %v1279_v59 = vmul.f32 1.442695, %v1250_v10 }
 0x421   : > { %2813 = vpow2.f32 %v1269_v49  ;;  %v1247_v56 = vsub.f32 %v3768_v21, %v1210_v45  ;;  %v1235_v55 = vpop.permute.xlu0 %1234 }
 0x422   : > { %2815 = vpow2.f32 %v1275_v54  ;;  %v1252_v61 = vsub.f32 %v3778_v27, %v1235_v55  ;;  %v1285_v54 = vld [vmem:[#allocation4] sm:$0xff] }
 0x423   : > { %v2808_v58 = vpop.eup %2807  ;;  %v1273_v19 = vmul.f32 1.442695, %v1247_v56  ;;  %v1301_v56 = vmul.f32 %v3935_v36, %v1285_v54  ;;  %v1291_v36 = vld [vmem:[#allocation4 + $0x30] sm:$0xff] }
 0x424   : > { %v1220_v16 = vpop.permute.xlu1 %1219  ;;  %v1496_v0 = vpack.c.bf16 %v2808_v58, %v2806_v22  ;;  %v1283_v48 = vmul.f32 1.442695, %v1252_v61  ;;  %v1287_v22 = vld [vmem:[#allocation4 + $0x10] sm:$0xff] }
 0x425   : > { %2817 = vpow2.f32 %v1273_v19  ;;  %v1249_v63 = vsub.f32 %v3776_v25, %v1220_v16  ;;  %v1303_v10 = vmul.f32 %v3957_v17, %v1287_v22  ;;  %v1288_v19 = vld [vmem:[#allocation4 + $0x18] sm:$0xff]  ;;  %v1286_v16 = vld [vmem:[#allocation4 + $0x8] sm:$0xff] }
 0x426   : > { %2506 = vmatprep.mubr.bf16.mxu1 %v1496_v0  ;;  %2819 = vpow2.f32 %v1279_v59  ;;  %v1304_v61 = vmul.f32 %v3943_v2, %v1288_v19 }
 0x427   : > { %v2810_v33 = vpop.eup %2809  ;;  %v1277_v30 = vmul.f32 1.442695, %v1249_v63 }
 0x428   : > { %v1230_v1 = vpop.permute.xlu1 %1229  ;;  %1331 = vadd.xlane.f32.xlu1 %v2810_v33  ;;  %v1497_v21 = vpack.c.bf16 %v2810_v33, %v2804_v24  ;;  %v2812_v4 = vpop.eup %2811  ;;  %v1302_v33 = vmul.f32 %v3949_v9, %v1286_v16  ;;  %v1292_v9 = vld [vmem:[#allocation4 + $0x38] sm:$0xff]  ;;  %v1298_v16 = vld [vmem:[#allocation4 + $0x68] sm:$0xff] }
 0x429   : > { %2821 = vpow2.f32 %v1277_v30  ;;  %v1251_v52 = vsub.f32 %v3780_v29, %v1230_v1  ;;  %v4017_v24 = vpop.permute.xlu0 %1400 }
 0x42a   : > { %2507 = vmatmul.mubr.bf16.gmra.mrb[4].mxu1 %v1497_v21  ;;  %2823 = vpow2.f32 %v1283_v48  ;;  %v1307_v48 = vmul.f32 %v3971_v31, %v1291_v36  ;;  %v1289_v21 = vld [vmem:[#allocation4 + $0x20] sm:$0xff] }
 0x42b   : > { %v2814_v46 = vpop.eup %2813  ;;  %v1281_v27 = vmul.f32 1.442695, %v1251_v52  ;;  %v1305_v2 = vmul.f32 %v3965_v60, %v1289_v21  ;;  %v1383_v21 = vld [vmem:[#allocation5 + $0x8] sm:$0xff] }
 0x42c   : > { %1327 = vadd.xlane.f32.xlu1 %v2808_v58  ;;  %v1498_v50 = vpack.c.bf16 %v2812_v4, %v2814_v46  ;;  %v2816_v25 = vpop.eup %2815  ;;  %v4019_v28 = vpop.permute.xlu1 %1405 }
 0x42d   : > { %2825 = vpow2.f32 %v1281_v27  ;;  %v4021_v38 = vpop.permute.xlu0 %1415  ;;  %v1308_v27 = vmul.f32 %v3959_v18, %v1292_v9  ;;  %v1294_v18 = vld [vmem:[#allocation4 + $0x48] sm:$0xff]  ;;  %v1479_v9 = vmul.f32 %v4019_v28, %v1383_v21 }
 0x42e   : > { %2510 = vmatprep.mubr.bf16.mxu1 %v1498_v50  ;;  %2827 = vpow2.f32 %v1153_v15  ;;  %v1293_v15 = vld [vmem:[#allocation4 + $0x40] sm:$0xff] }
 0x42f   : > { %v2818_v62 = vpop.eup %2817  ;;  %2829 = vpow2.f32 %v1155_v7  ;;  %v1309_v54 = vmul.f32 %v3983_v35, %v1293_v15 }
 0x430   : > { %1337 = vadd.xlane.f32.xlu0 %v2818_v62  ;;  %1339 = vadd.xlane.f32.xlu1 %v2816_v25  ;;  %v1499_v5 = vpack.c.bf16 %v2816_v25, %v2818_v62  ;;  %v2820_v6 = vpop.eup %2819  ;;  %v4023_v51 = vpop.permute.xlu1 %1410  ;;  %v1290_v25 = vld [vmem:[#allocation4 + $0x28] sm:$0xff] }
 0x431   : > { %v4025_v40 = vpop.permute.xlu0 %1425  ;;  %v1306_v31 = vmul.f32 %v3951_v14, %v1290_v25  ;;  %v1310_v14 = vmul.f32 %v3973_v32, %v1294_v18  ;;  %v1297_v32 = vld [vmem:[#allocation4 + $0x60] sm:$0xff] }
 0x432   : > { %2511 = vmatmul.mubr.bf16.gmra.mrb[8].mxu1 %v1499_v5 }
 0x433   : > { %v2822_v53 = vpop.eup %2821 }
 0x434   : > { %1333 = vadd.xlane.f32.xlu0 %v2814_v46  ;;  %1335 = vadd.xlane.f32.xlu1 %v2812_v4  ;;  %v1500_v29 = vpack.c.bf16 %v2820_v6, %v2822_v53  ;;  %v2824_v57 = vpop.eup %2823  ;;  %v4027_v26 = vpop.permute.xlu1 %1420 }
 0x435   : > { %v4029_v37 = vpop.permute.xlu0 %1435 }
 0x436   : > { %2514 = vmatprep.mubr.bf16.mxu1 %v1500_v29 }
 0x437   : > { %v2826_v12 = vpop.eup %2825 }
 0x438   : > { %1345 = vadd.xlane.f32.xlu0 %v2826_v12  ;;  %1347 = vadd.xlane.f32.xlu1 %v2824_v57  ;;  %v1501_v11 = vpack.c.bf16 %v2824_v57, %v2826_v12  ;;  %v4011_v20 = vpop.eup %2827  ;;  %v4031_v39 = vpop.permute.xlu1 %1430 }
 0x439   : > { %v4014_v8 = vpop.eup %2829  ;;  %v4033_v42 = vpop.permute.xlu0 %1455 }
 0x43a   : > { %2515 = vmatmul.mubr.bf16.gmra.mrb[12].mxu1 %v1501_v11 }
 0x43c   : > { %1341 = vadd.xlane.f32.xlu0 %v2822_v53  ;;  %1343 = vadd.xlane.f32.xlu1 %v2820_v6  ;;  %v4035_v13 = vpop.permute.xlu1 %1450  ;;  %v1296_v6 = vld [vmem:[#allocation4 + $0x58] sm:$0xff]  ;;  %v1295_v53 = vld [vmem:[#allocation4 + $0x50] sm:$0xff] }
 0x43d   : > { %v4037_v43 = vpop.permute.xlu0 %1445  ;;  %v1312_v60 = vmul.f32 %v3967_v3, %v1296_v6  ;;  %v1311_v57 = vmul.f32 %v3977_v23, %v1295_v53  ;;  %v1299_v3 = vld [vmem:[#allocation4 + $0x70] sm:$0xff]  ;;  %v1389_v6 = vld [vmem:[#allocation5 + $0x38] sm:$0xff] }
 0x43e   : > { %v1315_v19 = vmul.f32 %v4011_v20, %v1299_v3  ;;  %v1485_v28 = vmul.f32 %v4029_v37, %v1389_v6 }
 0x440   : > { %v4039_v44 = vpop.permute.xlu1 %1440 }
 0x441   : > { %v4041_v47 = vpop.permute.xlu0 %1465 }
 0x444   : > { %v4043_v49 = vpop.permute.xlu1 %1460 }
 0x44d   : > { %1470 = vperm.xlu1 %2750, %v4011_v20   ;;  %v1384_v20 = vld [vmem:[#allocation5 + $0x10] sm:$0xff] }
 0x452   : > { %1475 = vperm.xlu0 %2749, %v4014_v8  }
 0x49c   : > { %v1322_v45 = vpop.xlane.xlu0 %1321 }
 0x49d   : > { %v1351_v55 = vadd.f32 %v1322_v45, %v1303_v10  ;;  %v1318_v58 = vpop.xlane.xlu1 %1317 }
 0x49e   : > { %v1349_v59 = vadd.f32 %v1318_v58, %v1301_v56  ;;  %v1300_v56 = vld [vmem:[#allocation4 + $0x78] sm:$0xff] }
 0x49f   : > { %1368 = vst.msk [vmem:[#allocation4 + $0x10] sm:$0xff] %vm1365_vm1, %v1351_v55  ;;  %v1316_v58 = vmul.f32 %v4014_v8, %v1300_v56 }
 0x4a0   : > { %1366 = vst.msk [vmem:[#allocation4] sm:$0xff] %vm1365_vm1, %v1349_v59 }
 0x4a1   : > { %v1324_v0 = vpop.xlane.xlu1 %1323 }
 0x4a2   : > { %v1352_v63 = vadd.f32 %v1324_v0, %v1304_v61 }
 0x4a4   : > { %1369 = vst.msk [vmem:[#allocation4 + $0x18] sm:$0xff] %vm1365_vm1, %v1352_v63  ;;  %v1320_v17 = vpop.xlane.xlu0 %1319  ;;  %v1314_v63 = vmul.f32 %v3979_v34, %v1298_v16 }
 0x4a5   : > { %v1350_v30 = vadd.f32 %v1320_v17, %v1302_v33  ;;  %v1313_v33 = vmul.f32 %v3986_v41, %v1297_v32 }
 0x4a7   : > { %1367 = vst.msk [vmem:[#allocation4 + $0x8] sm:$0xff] %vm1365_vm1, %v1350_v30 }
 0x4a9   : > { %v1330_v1 = vpop.xlane.xlu0 %1329 }
 0x4aa   : > { %v1355_v52 = vadd.f32 %v1330_v1, %v1307_v48  ;;  %v1382_v48 = vld [vmem:[#allocation5] sm:$0xff]  ;;  %v1385_v1 = vld [vmem:[#allocation5 + $0x18] sm:$0xff] }
 0x4ab   : > { %v1481_v34 = vmul.f32 %v4021_v38, %v1385_v1 }
 0x4ac   : > { %1372 = vst.msk [vmem:[#allocation4 + $0x30] sm:$0xff] %vm1365_vm1, %v1355_v52  ;;  %v1480_v52 = vmul.f32 %v4023_v51, %v1384_v20  ;;  %v1386_v51 = vld [vmem:[#allocation5 + $0x20] sm:$0xff] }
 0x4ad   : > { %v1326_v4 = vpop.xlane.xlu0 %1325  ;;  %v1482_v38 = vmul.f32 %v4027_v26, %v1386_v51  ;;  %v1391_v26 = vld [vmem:[#allocation5 + $0x48] sm:$0xff] }
 0x4ae   : > { %v1353_v46 = vadd.f32 %v1326_v4, %v1305_v2  ;;  %v1478_v2 = vmul.f32 %v4017_v24, %v1382_v48  ;;  %v1387_v24 = vld [vmem:[#allocation5 + $0x28] sm:$0xff] }
 0x4b0   : > { %1370 = vst.msk [vmem:[#allocation4 + $0x20] sm:$0xff] %vm1365_vm1, %v1353_v46 }
 0x4b5   : > { %v1332_v50 = vpop.xlane.xlu1 %1331 }
 0x4b6   : > { %v1356_v62 = vadd.f32 %v1332_v50, %v1308_v27 }
 0x4b7   : > { %v1735_v6 = vld [vmem:[#allocation4 + $0x20] sm:$0xff] (!%p2342_p12) }
 0x4b8   : > { %1373 = vst.msk [vmem:[#allocation4 + $0x38] sm:$0xff] %vm1365_vm1, %v1356_v62 }
 0x4b9   : > { %v1328_v5 = vpop.xlane.xlu1 %1327 }
 0x4ba   : > { %v1354_v29 = vadd.f32 %v1328_v5, %v1306_v31  ;;  %v1388_v5 = vld [vmem:[#allocation5 + $0x30] sm:$0xff] }
 0x4bb   : > { %v1484_v53 = vmul.f32 %v4031_v39, %v1388_v5  ;;  %v1393_v39 = vld [vmem:[#allocation5 + $0x58] sm:$0xff] }
 0x4bc   : > { %1371 = vst.msk [vmem:[#allocation4 + $0x28] sm:$0xff] %vm1365_vm1, %v1354_v29 }
 0x4bd   : > { %v1340_v12 = vpop.xlane.xlu1 %1339  ;;  %v1338_v11 = vpop.xlane.xlu0 %1337 }
 0x4be   : > { %v1360_v7 = vadd.f32 %v1340_v12, %v1312_v60  ;;  %v1359_v22 = vadd.f32 %v1338_v11, %v1311_v57  ;;  %v1483_v12 = vmul.f32 %v4025_v40, %v1387_v24  ;;  %v1489_v40 = vmul.f32 %v4033_v42, %v1393_v39 }
 0x4c0   : > { %1377 = vst.msk [vmem:[#allocation4 + $0x58] sm:$0xff] %vm1365_vm1, %v1360_v7  ;;  %1376 = vst.msk [vmem:[#allocation4 + $0x50] sm:$0xff] %vm1365_vm1, %v1359_v22  ;;  %v1392_v22 = vld [vmem:[#allocation5 + $0x50] sm:$0xff] }
 0x4c1   : > { %v1336_v10 = vpop.xlane.xlu1 %1335  ;;  %v1334_v45 = vpop.xlane.xlu0 %1333 }
 0x4c2   : > { %v1358_v55 = vadd.f32 %v1336_v10, %v1310_v14  ;;  %v1357_v23 = vadd.f32 %v1334_v45, %v1309_v54  ;;  %v1390_v54 = vld [vmem:[#allocation5 + $0x40] sm:$0xff]  ;;  %v1488_v10 = vmul.f32 %v4035_v13, %v1392_v22  ;;  %v1397_v13 = vld [vmem:[#allocation5 + $0x78] sm:$0xff] }
 0x4c3   : > { %v1486_v37 = vmul.f32 %v4039_v44, %v1390_v54  ;;  %v1736_v5 = vld [vmem:[#allocation4 + $0x28] sm:$0xff] (!%p2342_p12) }
 0x4c4   : > { %1375 = vst.msk [vmem:[#allocation4 + $0x48] sm:$0xff] %vm1365_vm1, %v1358_v55  ;;  %1374 = vst.msk [vmem:[#allocation4 + $0x40] sm:$0xff] %vm1365_vm1, %v1357_v23  ;;  %v1487_v55 = vmul.f32 %v4037_v43, %v1391_v26  ;;  %v2839_v26 = vld [vmem:[#allocation14 + $0x30] sm:$0xff] (!%p2342_p12)  }
 0x4c5   : > { %v1348_v59 = vpop.xlane.xlu1 %1347  ;;  %v1346_v61 = vpop.xlane.xlu0 %1345 }
 0x4c6   : > { %v1364_v0 = vadd.f32 %v1348_v59, %v1316_v58  ;;  %v1363_v35 = vadd.f32 %v1346_v61, %v1315_v19  ;;  %v1396_v61 = vld [vmem:[#allocation5 + $0x70] sm:$0xff] }
 0x4c8   : > { %1381 = vst.msk [vmem:[#allocation4 + $0x78] sm:$0xff] %vm1365_vm1, %v1364_v0  ;;  %1380 = vst.msk [vmem:[#allocation4 + $0x70] sm:$0xff] %vm1365_vm1, %v1363_v35  ;;  %v1394_v0 = vld [vmem:[#allocation5 + $0x60] sm:$0xff]  ;;  %v1395_v35 = vld [vmem:[#allocation5 + $0x68] sm:$0xff] }
 0x4c9   : > { %v1344_v17 = vpop.xlane.xlu1 %1343  ;;  %v1342_v30 = vpop.xlane.xlu0 %1341 }
 0x4ca   : > { %v1362_v36 = vadd.f32 %v1344_v17, %v1314_v63  ;;  %v1361_v8 = vadd.f32 %v1342_v30, %v1313_v33  ;;  %v1490_v63 = vmul.f32 %v4043_v49, %v1394_v0  ;;  %v1731_v49 = vld [vmem:[#allocation4] sm:$0xff] (!%p2342_p12) }
 0x4cc   : > { %1379 = vst.msk [vmem:[#allocation4 + $0x68] sm:$0xff] %vm1365_vm1, %v1362_v36  ;;  %1378 = vst.msk [vmem:[#allocation4 + $0x60] sm:$0xff] %vm1365_vm1, %v1361_v8  ;;  %v1491_v36 = vmul.f32 %v4041_v47, %v1395_v35  ;;  %v1732_v47 = vld [vmem:[#allocation4 + $0x8] sm:$0xff] (!%p2342_p12) }
 0x4cd   : > { %v1471_v16 = vpop.permute.xlu1 %1470 }
 0x4ce   : > { %v1492_v42 = vmul.f32 %v1471_v16, %v1396_v61 }
 0x4cf   : > { %v1746_v22 = vld [vmem:[#allocation4 + $0x78] sm:$0xff] (!%p2342_p12)  ;;  %v1745_v54 = vld [vmem:[#allocation4 + $0x70] sm:$0xff] (!%p2342_p12) }
 0x4d1   : > { %v1476_v44 = vpop.permute.xlu0 %1475 }
 0x4d2   : > { %v1493_v43 = vmul.f32 %v1476_v44, %v1397_v13 }
 0x4ed   : > { %v2504_v4 = vpop.f32.mrb[0].mxu1 }
 0x4ee   : > { %v1665_v41 = vadd.f32 %v2504_v4, %v1480_v52  ;;  %v1600_v46 = vpop.f32.mrb[1].mxu1  ;;  %v1739_v52 = vld [vmem:[#allocation4 + $0x40] sm:$0xff] (!%p2342_p12)  ;;  %v3179_v4 = vmov (!%p2342_p12), 0  }
 0x4ef   : > { %v1663_v27 = vadd.f32 %v1600_v46, %v1478_v2  ;;  %v2505_v50 = vpop.f32.mrb[2].mxu1  ;;  %v1740_v2 = vld [vmem:[#allocation4 + $0x48] sm:$0xff] (!%p2342_p12)  ;;  %2832 = vset.pattern.permute.xlu1 (!%p2342_p12), %v3179_v4  ;;  %2831 = vset.pattern.permute.xlu0 (!%p2342_p12), %v3179_v4  ;;  %2841 = vrcp.f32 (!%p2342_p12), %v1739_v52  ;;  %v2833_v46 = vld [vmem:[#allocation14] sm:$0xff] (!%p2342_p12)  }
 0x4f0   : > { %1681 = vst [vmem:[#allocation5 + $0x10] sm:$0xff] %v1665_v41  ;;  %v1666_v25 = vadd.f32 %v2505_v50, %v1481_v34  ;;  %v1603_v62 = vpop.f32.mrb[3].mxu1  ;;  %2843 = vrcp.f32 (!%p2342_p12), %v1731_v49  ;;  %v1734_v34 = vld [vmem:[#allocation4 + $0x18] sm:$0xff] (!%p2342_p12)  ;;  %v1733_v41 = vld [vmem:[#allocation4 + $0x10] sm:$0xff] (!%p2342_p12)  ;;  %2518 = vmatprep.subr.bf16.mxu0 (!%p2342_p12), %v2833_v46  ;;  %2566 = vmatprep.subr.bf16.mxu1 (!%p2342_p12), %v2833_v46 }
 0x4f1   : > { %1679 = vst [vmem:[#allocation5] sm:$0xff] %v1663_v27  ;;  %v1664_v31 = vadd.f32 %v1603_v62, %v1479_v9  ;;  %2845 = vrcp.f32 (!%p2342_p12), %v1740_v2  ;;  %v2834_v9 = vld [vmem:[#allocation14 + $0x8] sm:$0xff] (!%p2342_p12)   ;;  %v1742_v27 = vld [vmem:[#allocation4 + $0x58] sm:$0xff] (!%p2342_p12)  ;;  %v1741_v50 = vld [vmem:[#allocation4 + $0x50] sm:$0xff] (!%p2342_p12)  ;;  %2519 = vmatpush3.bf16.msra.mxu0 (!%p2342_p12), %v2833_v46  ;;  %2574 = vmatpush3.bf16.msra.mxu1 (!%p2342_p12), %v2833_v46 }
 0x4f2   : > { %1682 = vst [vmem:[#allocation5 + $0x18] sm:$0xff] %v1666_v25  ;;  %2847 = vrcp.f32 (!%p2342_p12), %v1732_v47  ;;  %2520 = vmatprep.subr.bf16.mxu0 (!%p2342_p12), %v2834_v9  ;;  %2567 = vmatprep.subr.bf16.mxu1 (!%p2342_p12), %v2834_v9  ;;  %v2835_v25 = vld [vmem:[#allocation14 + $0x10] sm:$0xff] (!%p2342_p12)  }
 0x4f3   : > { %1680 = vst [vmem:[#allocation5 + $0x8] sm:$0xff] %v1664_v31  ;;  %2849 = vrcp.f32 (!%p2342_p12), %v1734_v34 }
 0x4f4   : > { %2851 = vrcp.f32 (!%p2342_p12), %v1733_v41 }
 0x4f5   : > { %2853 = vrcp.f32 (!%p2342_p12), %v1742_v27  ;;  %2521 = vmatpush3.bf16.msra.mxu0 (!%p2342_p12), %v2834_v9  ;;  %2575 = vmatpush3.bf16.msra.mxu1 (!%p2342_p12), %v2834_v9 }
 0x4f6   : > { %2855 = vrcp.f32 (!%p2342_p12), %v1741_v50  ;;  %2522 = vmatprep.subr.bf16.mxu0 (!%p2342_p12), %v2835_v25  ;;  %2568 = vmatprep.subr.bf16.mxu1 (!%p2342_p12), %v2835_v25 }
 0x4f7   : > { %2857 = vrcp.f32 (!%p2342_p12), %v1736_v5 }
 0x4f8   : > { %2859 = vrcp.f32 (!%p2342_p12), %v1735_v6  ;;  %v1715_v61 = vld [vmem:[#allocation5] sm:$0xff] (!%p2342_p12) }
 0x4f9   : > { %v2842_v62 = vpop.eup (!%p2342_p12), %2841  ;;  %2523 = vmatpush3.bf16.msra.mxu0 (!%p2342_p12), %v2835_v25  ;;  %2576 = vmatpush3.bf16.msra.mxu1 (!%p2342_p12), %v2835_v25 }
 0x4fa   : > { %v2844_v31 = vpop.eup (!%p2342_p12), %2843  ;;  %1805 = vperm.xlu1 (!%p2342_p12), %2832, %v2842_v62   ;;  %v1716_v16 = vld [vmem:[#allocation5 + $0x8] sm:$0xff] (!%p2342_p12) }
 0x4fb   : > { %v2846_v51 = vpop.eup (!%p2342_p12), %2845  ;;  %1765 = vperm.xlu0 (!%p2342_p12), %2831, %v2844_v31  }
 0x4fc   : > { %v2848_v24 = vpop.eup (!%p2342_p12), %2847 }
 0x4fd   : > { %v2508_v29 = vpop.f32.mrb[4].mxu1 }
 0x4fe   : > { %v1669_v60 = vadd.f32 %v2508_v29, %v1484_v53  ;;  %v1616_v57 = vpop.f32.mrb[5].mxu1  ;;  %v2836_v53 = vld [vmem:[#allocation14 + $0x18] sm:$0xff] (!%p2342_p12)   ;;  %1810 = vperm.xlu1 (!%p2342_p12), %2832, %v2846_v51   ;;  %v2850_v29 = vpop.eup (!%p2342_p12), %2849 }
 0x4ff   : > { %v1667_v11 = vadd.f32 %v1616_v57, %v1482_v38  ;;  %v2509_v18 = vpop.f32.mrb[6].mxu1  ;;  %v1744_v38 = vld [vmem:[#allocation4 + $0x68] sm:$0xff] (!%p2342_p12)  ;;  %1770 = vperm.xlu0 (!%p2342_p12), %2831, %v2848_v24   ;;  %2524 = vmatprep.subr.bf16.mxu0 (!%p2342_p12), %v2836_v53  ;;  %v2837_v57 = vld [vmem:[#allocation14 + $0x20] sm:$0xff] (!%p2342_p12)  }
 0x500   : > { %1685 = vst [vmem:[#allocation5 + $0x30] sm:$0xff] %v1669_v60  ;;  %v1670_v15 = vadd.f32 %v2509_v18, %v1485_v28  ;;  %v1619_v7 = vpop.f32.mrb[7].mxu1  ;;  %v1743_v28 = vld [vmem:[#allocation4 + $0x60] sm:$0xff] (!%p2342_p12)  ;;  %v2852_v60 = vpop.eup (!%p2342_p12), %2851  ;;  %2861 = vrcp.f32 (!%p2342_p12), %v1744_v38  ;;  %2569 = vmatprep.subr.bf16.mxu1 (!%p2342_p12), %v2836_v53  ;;  %v1737_v18 = vld [vmem:[#allocation4 + $0x30] sm:$0xff] (!%p2342_p12)  ;;  %2525 = vmatpush3.bf16.msra.mxu0 (!%p2342_p12), %v2836_v53 }
 0x501   : > { %1683 = vst [vmem:[#allocation5 + $0x20] sm:$0xff] %v1667_v11  ;;  %v1668_v14 = vadd.f32 %v1619_v7, %v1483_v12  ;;  %2863 = vrcp.f32 (!%p2342_p12), %v1743_v28  ;;  %v1738_v12 = vld [vmem:[#allocation4 + $0x38] sm:$0xff] (!%p2342_p12)  ;;  %v2854_v11 = vpop.eup (!%p2342_p12), %2853  ;;  %2526 = vmatprep.subr.bf16.mxu0 (!%p2342_p12), %v2837_v57  ;;  %2577 = vmatpush3.bf16.msra.mxu1 (!%p2342_p12), %v2836_v53  ;;  %v2838_v7 = vld [vmem:[#allocation14 + $0x28] sm:$0xff] (!%p2342_p12)  }
 0x502   : > { %1686 = vst [vmem:[#allocation5 + $0x38] sm:$0xff] %v1670_v15  ;;  %1780 = vperm.xlu1 (!%p2342_p12), %2832, %v2850_v29   ;;  %v2856_v15 = vpop.eup (!%p2342_p12), %2855  ;;  %2865 = vrcp.f32 (!%p2342_p12), %v1738_v12  ;;  %2570 = vmatprep.subr.bf16.mxu1 (!%p2342_p12), %v2837_v57 }
 0x503   : > { %1684 = vst [vmem:[#allocation5 + $0x28] sm:$0xff] %v1668_v14  ;;  %1775 = vperm.xlu0 (!%p2342_p12), %2831, %v2852_v60   ;;  %2867 = vrcp.f32 (!%p2342_p12), %v1737_v18  ;;  %v2858_v14 = vpop.eup (!%p2342_p12), %2857 }
 0x504   : > { %2527 = vmatpush3.bf16.msra.mxu0 (!%p2342_p12), %v2837_v57  ;;  %v2860_v39 = vpop.eup (!%p2342_p12), %2859  ;;  %2869 = vrcp.f32 (!%p2342_p12), %v1746_v22 }
 0x505   : > { %v2512_v45 = vpop.f32.mrb[8].mxu1  ;;  %2528 = vmatprep.subr.bf16.mxu0 (!%p2342_p12), %v2838_v7  ;;  %2578 = vmatpush3.bf16.msra.mxu1 (!%p2342_p12), %v2837_v57  ;;  %2871 = vrcp.f32 (!%p2342_p12), %v1745_v54 }
 0x506   : > { %v1673_v56 = vadd.f32 %v2512_v45, %v1488_v10  ;;  %v1632_v3 = vpop.f32.mrb[9].mxu1  ;;  %1820 = vperm.xlu1 (!%p2342_p12), %2832, %v2854_v11   ;;  %2571 = vmatprep.subr.bf16.mxu1 (!%p2342_p12), %v2838_v7  ;;  %v2840_v45 = vld [vmem:[#allocation14 + $0x38] sm:$0xff] (!%p2342_p12)  }
 0x507   : > { %v1671_v23 = vadd.f32 %v1632_v3, %v1486_v37  ;;  %v2513_v58 = vpop.f32.mrb[10].mxu1  ;;  %1815 = vperm.xlu0 (!%p2342_p12), %2831, %v2856_v15   ;;  %v1721_v38 = vld [vmem:[#allocation5 + $0x30] sm:$0xff] (!%p2342_p12) }
 0x508   : > { %1689 = vst [vmem:[#allocation5 + $0x50] sm:$0xff] %v1673_v56  ;;  %v1674_v19 = vadd.f32 %v2513_v58, %v1489_v40  ;;  %v1635_v59 = vpop.f32.mrb[11].mxu1  ;;  %2529 = vmatpush3.bf16.msra.mxu0 (!%p2342_p12), %v2838_v7  ;;  %v1719_v34 = vld [vmem:[#allocation5 + $0x20] sm:$0xff] (!%p2342_p12) }
 0x509   : > { %1687 = vst [vmem:[#allocation5 + $0x40] sm:$0xff] %v1671_v23  ;;  %v1672_v32 = vadd.f32 %v1635_v59, %v1487_v55  ;;  %2530 = vmatprep.subr.bf16.mxu0 (!%p2342_p12), %v2839_v26  ;;  %2579 = vmatpush3.bf16.msra.mxu1 (!%p2342_p12), %v2838_v7  ;;  %v1722_v53 = vld [vmem:[#allocation5 + $0x38] sm:$0xff] (!%p2342_p12) }
 0x50a   : > { %1690 = vst [vmem:[#allocation5 + $0x58] sm:$0xff] %v1674_v19  ;;  %1790 = vperm.xlu1 (!%p2342_p12), %2832, %v2858_v14   ;;  %v2862_v10 = vpop.eup (!%p2342_p12), %2861  ;;  %2572 = vmatprep.subr.bf16.mxu1 (!%p2342_p12), %v2839_v26  ;;  %v1720_v47 = vld [vmem:[#allocation5 + $0x28] sm:$0xff] (!%p2342_p12) }
 0x50b   : > { %1688 = vst [vmem:[#allocation5 + $0x48] sm:$0xff] %v1672_v32  ;;  %1785 = vperm.xlu0 (!%p2342_p12), %2831, %v2860_v39   ;;  %v2864_v37 = vpop.eup (!%p2342_p12), %2863 }
 0x50c   : > { %v2866_v40 = vpop.eup (!%p2342_p12), %2865  ;;  %2531 = vmatpush3.bf16.msra.mxu0 (!%p2342_p12), %v2839_v26 }
 0x50d   : > { %v2516_v33 = vpop.f32.mrb[12].mxu1  ;;  %1714 = sbr.rel (%p2342_p12) target bundleno = 1655 (0x677), region = 88  ;;  %v2868_v56 = vpop.eup (!%p2342_p12), %2867  ;;  %2532 = vmatprep.subr.bf16.mxu0 (!%p2342_p12), %v2840_v45  ;;  %2580 = vmatpush3.bf16.msra.mxu1 (!%p2342_p12), %v2839_v26  ;;  %v4095_v26 = vld [vmem:[%s4343_s3] ss:$0 sm:$0xff] (!%p2342_p12) }
 0x50e   : > { %v1677_v17 = vadd.f32 %v2516_v33, %v1492_v42  ;;  %v1648_v30 = vpop.f32.mrb[13].mxu1  ;;  %1830 = vperm.xlu1 (!%p2342_p12), %2832, %v2862_v10   ;;  %2573 = vmatprep.subr.bf16.mxu1 (!%p2342_p12), %v2840_v45  ;;  %v2870_v3 = vpop.eup (!%p2342_p12), %2869  ;;  %v1717_v33 = vld [vmem:[#allocation5 + $0x10] sm:$0xff] (!%p2342_p12) }
 0x50f   : > { %v1675_v8 = vadd.f32 %v1648_v30, %v1490_v63  ;;  %v2517_v20 = vpop.f32.mrb[14].mxu1  ;;  %1825 = vperm.xlu0 (!%p2342_p12), %2831, %v2864_v37   ;;  %v2872_v55 = vpop.eup (!%p2342_p12), %2871  ;;  %v1718_v63 = vld [vmem:[#allocation5 + $0x18] sm:$0xff] (!%p2342_p12)  ;;  %v2037_v37 = vld [vmem:[%s3601_s9 + $0x10] sm:$0xff] (!%p2342_p12) }
 0x510   : > { %1693 = vst [vmem:[#allocation5 + $0x70] sm:$0xff] %v1677_v17  ;;  %v1678_v48 = vadd.f32 %v2517_v20, %v1493_v43  ;;  %v1651_v1 = vpop.f32.mrb[15].mxu1  ;;  %2533 = vmatpush3.bf16.msra.mxu0 (!%p2342_p12), %v2840_v45  ;;  %v1723_v19 = vld [vmem:[#allocation5 + $0x40] sm:$0xff] (!%p2342_p12) }
 0x511   : > { %1691 = vst [vmem:[#allocation5 + $0x60] sm:$0xff] %v1675_v8  ;;  %v1676_v21 = vadd.f32 %v1651_v1, %v1491_v36  ;;  %2581 = vmatpush3.bf16.msra.mxu1 (!%p2342_p12), %v2840_v45  ;;  %v1725_v1 = vld [vmem:[#allocation5 + $0x50] sm:$0xff] (!%p2342_p12) }
 0x512   : > { %1694 = vst [vmem:[#allocation5 + $0x78] sm:$0xff] %v1678_v48  ;;  %1800 = vperm.xlu1 (!%p2342_p12), %2832, %v2866_v40   ;;  %v1724_v59 = vld [vmem:[#allocation5 + $0x48] sm:$0xff] (!%p2342_p12)  ;;  %v1726_v48 = vld [vmem:[#allocation5 + $0x58] sm:$0xff] (!%p2342_p12) }
 0x513   : > { %1692 = vst [vmem:[#allocation5 + $0x68] sm:$0xff] %v1676_v21  ;;  %1795 = vperm.xlu0 (!%p2342_p12), %2831, %v2868_v56   ;;  %v2035_v56 = vld [vmem:[%s3601_s9] sm:$0xff] (!%p2342_p12) }
 0x516   : > { %1840 = vperm.xlu1 %2832, %v2870_v3  }
 0x517   : > { %1835 = vperm.xlu0 %2831, %v2872_v55   ;;  %v1729_v18 = vld [vmem:[#allocation5 + $0x70] sm:$0xff] }
 0x518   : > { %v1727_v62 = vld [vmem:[#allocation5 + $0x60] sm:$0xff] }
 0x519   : > { %v1730_v11 = vld [vmem:[#allocation5 + $0x78] sm:$0xff] }
 0x51a   : > { %v1728_v25 = vld [vmem:[#allocation5 + $0x68] sm:$0xff] }
 0x579   : > { %v1806_v23 = vpop.permute.xlu1 %1805 }
 0x57a   : > { %v1766_v58 = vpop.permute.xlu0 %1765  ;;  %v1851_v0 = vmul.f32 %v1806_v23, %v1723_v19  ;;  %v2038_v23 = vld [vmem:[%s3601_s9 + $0x18] sm:$0xff] }
 0x57b   : > { %v1843_v35 = vmul.f32 %v1766_v58, %v1715_v61  ;;  %v2036_v61 = vld [vmem:[%s3601_s9 + $0x8] sm:$0xff] }
 0x57d   : > { %v1811_v32 = vpop.permute.xlu1 %1810 }
 0x57e   : > { %v1852_v13 = vmul.f32 %v1811_v32, %v1724_v59  ;;  %v1771_v44 = vpop.permute.xlu0 %1770 }
 0x57f   : > { %v1844_v42 = vmul.f32 %v1771_v44, %v1716_v16 }
 0x580   : > { %v1863_v43 = vpack.c.bf16 %v1852_v13, %v1851_v0  ;;  %v2045_v13 = vld [vmem:[%s3601_s9 + $0x50] sm:$0xff] }
 0x581   : > { %v1781_v17 = vpop.permute.xlu1 %1780  ;;  %v1859_v30 = vpack.c.bf16 %v1844_v42, %v1843_v35 }
 0x582   : > { %v1846_v36 = vmul.f32 %v1781_v17, %v1718_v63  ;;  %v1776_v8 = vpop.permute.xlu0 %1775  ;;  %2542 = vmatprep.mubr.bf16.mxu1 %v1863_v43  ;;  %v2043_v63 = vld [vmem:[%s3601_s9 + $0x40] sm:$0xff] }
 0x583   : > { %v1845_v20 = vmul.f32 %v1776_v8, %v1717_v33  ;;  %2534 = vmatprep.mubr.bf16.mxu0 %v1859_v30  ;;  %v2046_v30 = vld [vmem:[%s3601_s9 + $0x58] sm:$0xff] }
 0x585   : > { %v1860_v21 = vpack.c.bf16 %v1846_v36, %v1845_v20  ;;  %v1821_v52 = vpop.permute.xlu1 %1820 }
 0x586   : > { %v1854_v49 = vmul.f32 %v1821_v52, %v1726_v48  ;;  %v1816_v2 = vpop.permute.xlu0 %1815  ;;  %v2044_v48 = vld [vmem:[%s3601_s9 + $0x48] sm:$0xff] }
 0x587   : > { %v1853_v4 = vmul.f32 %v1816_v2, %v1725_v1  ;;  %2535 = vmatmul.mubr.bf16.vlgmr.msra.gmra.mrb[0].mxu0 %v1860_v21 }
 0x589   : > { %v1864_v41 = vpack.c.bf16 %v1854_v49, %v1853_v4  ;;  %v1791_v46 = vpop.permute.xlu1 %1790  ;;  %v2041_v4 = vld [vmem:[%s3601_s9 + $0x30] sm:$0xff] }
 0x58a   : > { %v1848_v9 = vmul.f32 %v1791_v46, %v1720_v47  ;;  %v1786_v27 = vpop.permute.xlu0 %1785 }
 0x58b   : > { %v1847_v50 = vmul.f32 %v1786_v27, %v1719_v34  ;;  %2543 = vmatmul.mubr.bf16.vlgmr.msra.gmra.mrb[0].mxu1 %v1864_v41  ;;  %v2039_v41 = vld [vmem:[%s3601_s9 + $0x20] sm:$0xff]  ;;  %v2042_v27 = vld [vmem:[%s3601_s9 + $0x38] sm:$0xff] }
 0x58d   : > { %v1861_v31 = vpack.c.bf16 %v1848_v9, %v1847_v50  ;;  %v1831_v5 = vpop.permute.xlu1 %1830 }
 0x58e   : > { %v1856_v51 = vmul.f32 %v1831_v5, %v1728_v25  ;;  %v1826_v6 = vpop.permute.xlu0 %1825 }
 0x58f   : > { %v1855_v24 = vmul.f32 %v1826_v6, %v1727_v62  ;;  %2538 = vmatprep.mubr.bf16.mxu0 %v1861_v31  ;;  %v2040_v31 = vld [vmem:[%s3601_s9 + $0x28] sm:$0xff] }
 0x591   : > { %v1865_v29 = vpack.c.bf16 %v1856_v51, %v1855_v24  ;;  %v1801_v28 = vpop.permute.xlu1 %1800  ;;  %v2049_v24 = vld [vmem:[%s3601_s9 + $0x70] sm:$0xff] }
 0x592   : > { %v1850_v60 = vmul.f32 %v1801_v28, %v1722_v53  ;;  %v1796_v57 = vpop.permute.xlu0 %1795  ;;  %v2047_v28 = vld [vmem:[%s3601_s9 + $0x60] sm:$0xff] }
 0x593   : > { %v1849_v12 = vmul.f32 %v1796_v57, %v1721_v38  ;;  %2546 = vmatprep.mubr.bf16.mxu1 %v1865_v29 }
 0x595   : > { %v1862_v15 = vpack.c.bf16 %v1850_v60, %v1849_v12  ;;  %v1841_v7 = vpop.permute.xlu1 %1840 }
 0x596   : > { %v1858_v22 = vmul.f32 %v1841_v7, %v1730_v11  ;;  %v1836_v14 = vpop.permute.xlu0 %1835  ;;  %v2050_v11 = vld [vmem:[%s3601_s9 + $0x78] sm:$0xff] }
 0x597   : > { %v1857_v54 = vmul.f32 %v1836_v14, %v1729_v18  ;;  %2539 = vmatmul.mubr.bf16.gmra.mrb[4].mxu0 %v1862_v15 }
 0x599   : > { %v1866_v39 = vpack.c.bf16 %v1858_v22, %v1857_v54  ;;  %v2048_v22 = vld [vmem:[%s3601_s9 + $0x68] sm:$0xff] }
 0x59b   : > { %2547 = vmatmul.mubr.bf16.gmra.mrb[4].mxu1 %v1866_v39 }
 0x65a   : > { %v2536_v10 = vpop.f32.mrb[0].mxu0 }
 0x65b   : > { %v1981_v45 = vadd.f32 %v2536_v10, %v4095_v26  ;;  %v1972_v40 = vpop.f32.mrb[1].mxu0 }
 0x65c   : > { %v1973_v3 = vadd.f32 %v4095_v26, %v1972_v40  ;;  %v2537_v55 = vpop.f32.mrb[2].mxu0 }
 0x65d   : > { %v2053_v58 = vadd.f32 %v2037_v37, %v1981_v45  ;;  %v1984_v19 = vadd.f32 %v2537_v55, %v4095_v26  ;;  %v1975_v59 = vpop.f32.mrb[3].mxu0 }
 0x65e   : > { %v2051_v16 = vadd.f32 %v2035_v56, %v1973_v3  ;;  %v1976_v32 = vadd.f32 %v4095_v26, %v1975_v59  ;;  %v2544_v0 = vpop.f32.mrb[0].mxu1 }
 0x65f   : > { %2069 = vst [vmem:[%s3637_s0 + $0x10] sm:$0xff] %v2053_v58  ;;  %v2054_v44 = vadd.f32 %v2038_v23, %v1984_v19  ;;  %v2013_v35 = vadd.f32 %v2544_v0, %v4095_v26  ;;  %v2004_v42 = vpop.f32.mrb[1].mxu1 }
 0x660   : > { %2067 = vst [vmem:[%s3637_s0] sm:$0xff] %v2051_v16  ;;  %v2052_v33 = vadd.f32 %v2036_v61, %v1976_v32  ;;  %v2005_v43 = vadd.f32 %v4095_v26, %v2004_v42  ;;  %v2545_v17 = vpop.f32.mrb[2].mxu1 }
 0x661   : > { %2070 = vst [vmem:[%s3637_s0 + $0x18] sm:$0xff] %v2054_v44  ;;  %v2061_v36 = vadd.f32 %v2045_v13, %v2013_v35  ;;  %v2016_v8 = vadd.f32 %v2545_v17, %v4095_v26  ;;  %v2007_v20 = vpop.f32.mrb[3].mxu1 }
 0x662   : > { %2068 = vst [vmem:[%s3637_s0 + $0x8] sm:$0xff] %v2052_v33  ;;  %v2059_v1 = vadd.f32 %v2043_v63, %v2005_v43  ;;  %v2008_v21 = vadd.f32 %v4095_v26, %v2007_v20 }
 0x663   : > { %2077 = vst [vmem:[%s3637_s0 + $0x50] sm:$0xff] %v2061_v36  ;;  %v2062_v52 = vadd.f32 %v2046_v30, %v2016_v8 }
 0x664   : > { %2075 = vst [vmem:[%s3637_s0 + $0x40] sm:$0xff] %v2059_v1  ;;  %v2060_v49 = vadd.f32 %v2044_v48, %v2008_v21 }
 0x665   : > { %2078 = vst [vmem:[%s3637_s0 + $0x58] sm:$0xff] %v2062_v52 }
 0x666   : > { %2076 = vst [vmem:[%s3637_s0 + $0x48] sm:$0xff] %v2060_v49 }
 0x66a   : > { %v2540_v2 = vpop.f32.mrb[4].mxu0 }
 0x66b   : > { %v1997_v47 = vadd.f32 %v2540_v2, %v4095_v26  ;;  %v1988_v34 = vpop.f32.mrb[5].mxu0 }
 0x66c   : > { %v1989_v46 = vadd.f32 %v4095_v26, %v1988_v34  ;;  %v2541_v9 = vpop.f32.mrb[6].mxu0 }
 0x66d   : > { %v2057_v50 = vadd.f32 %v2041_v4, %v1997_v47  ;;  %v2000_v25 = vadd.f32 %v2541_v9, %v4095_v26  ;;  %v1991_v62 = vpop.f32.mrb[7].mxu0 }
 0x66e   : > { %v2055_v5 = vadd.f32 %v2039_v41, %v1989_v46  ;;  %v1992_v51 = vadd.f32 %v4095_v26, %v1991_v62  ;;  %v2548_v6 = vpop.f32.mrb[4].mxu1 }
 0x66f   : > { %2073 = vst [vmem:[%s3637_s0 + $0x30] sm:$0xff] %v2057_v50  ;;  %v2058_v53 = vadd.f32 %v2042_v27, %v2000_v25  ;;  %v2029_v38 = vadd.f32 %v2548_v6, %v4095_v26  ;;  %v2020_v29 = vpop.f32.mrb[5].mxu1 }
 0x670   : > { %2071 = vst [vmem:[%s3637_s0 + $0x20] sm:$0xff] %v2055_v5  ;;  %v2056_v60 = vadd.f32 %v2040_v31, %v1992_v51  ;;  %v2021_v57 = vadd.f32 %v4095_v26, %v2020_v29  ;;  %v2549_v12 = vpop.f32.mrb[6].mxu1 }
 0x671   : > { %2074 = vst [vmem:[%s3637_s0 + $0x38] sm:$0xff] %v2058_v53  ;;  %v2065_v18 = vadd.f32 %v2049_v24, %v2029_v38  ;;  %v2032_v15 = vadd.f32 %v2549_v12, %v4095_v26  ;;  %v2023_v7 = vpop.f32.mrb[7].mxu1 }
 0x672   : > { %2072 = vst [vmem:[%s3637_s0 + $0x28] sm:$0xff] %v2056_v60  ;;  %v2063_v14 = vadd.f32 %v2047_v28, %v2021_v57  ;;  %v2024_v54 = vadd.f32 %v4095_v26, %v2023_v7 }
 0x673   : > { %2081 = vst [vmem:[%s3637_s0 + $0x70] sm:$0xff] %v2065_v18  ;;  %v2066_v39 = vadd.f32 %v2050_v11, %v2032_v15 }
 0x674   : > { %2079 = vst [vmem:[%s3637_s0 + $0x60] sm:$0xff] %v2063_v14  ;;  %v2064_v10 = vadd.f32 %v2048_v22, %v2024_v54 }
 0x675   : > { %2082 = vst [vmem:[%s3637_s0 + $0x78] sm:$0xff] %v2066_v39 }
 0x676   : > { %2080 = vst [vmem:[%s3637_s0 + $0x68] sm:$0xff] %v2064_v10 }
 0x677 PF: > { %s4344_s17 = sld [smem:[#allocation24_spill]]  ;;  %s4345_s1 = sld [smem:[#allocation25_spill]] }
 0x678   : > { %s4346_s29 = sld [smem:[#allocation32_spill]]  ;;  %s2099_s19 = sshll.u32 %s3637_s0, 4  ;;  %s4148_s19 = int_to_ptr.vmem [resolvable:$true] %s2099_s19 }
 0x679   : > { %s4347_s13 = sld [smem:[#allocation43_spill]]  ;;  %s2084_s21 = scalar_lea.sflag [#allocation8], %s3597_s14 }
 0x67a   : > { %s3019_s11 = scalar_lea.vmem %s4148_s19, 2048  ;;  %s3180_s6 = smov [#allocation15]  }
 0x67b   : > { %p3020_p2 = scmp.ne.s32.totalorder %s4148_s19, %s3019_s11  ;;  %s3023_s0 = sshll.u32 %s3180_s6, 4  ;;  %s3024_s0 = int_to_ptr.vmem [resolvable:$false] %s3023_s0 }
 0x67c   : > { %s3025_s23 = scalar_lea.vmem %s3024_s0, 4096  ;;  %p3026_p4 = scmp.lt.s32.totalorder %s4148_s19, %s3024_s0 }
 0x67d   : > { %s2353_s5 = sshll.u32 %s4344_s17, 4  ;;  %s2354_s20 = sshll.u32 %s4345_s1, 5 }
 0x67e   : > { %s2096_s9 = sadd.s32 %s2354_s20, %s2353_s5  ;;  %p4349_p9 = scmp.ne.s32.totalorder %s4346_s29, 0 }
 0x67f   : > { %s2355_s7 = sshll.u32 %s2096_s9, 7  ;;  %s4348_s8 = smov %s4347_s13 }
 0x680   : > { %s4153_s27 = scalar_lea.hbm %s4347_s13, %s2355_s7  ;;  %p3021_p3 = pnand %p3020_p2, %p4349_p9 }
 0x681   : > { %p3027_p7 = scmp.lt.s32.totalorder %s3025_s23, %s3019_s11 }
 0x682   : > { %p3022_p13 = pneg %p3021_p3 }
 0x683   : > { %p3028_p0 = por %p3027_p7, %p3026_p4 }
 0x685   : > { %p3029_p10 = pnand %p3028_p0, %p3022_p13 }
 0x687   : > { %3032 = shalt.err (!%p3029_p10)
}
 0x688   : > { %s3033_s10 = scalar_lea.hbm %s4153_s27, 2048  ;;  %s3037_s1 = scalar_lea.hbm %s4348_s8, 8192 }
 0x689   : > { %p3034_p1 = scmp.ne.s32.totalorder %s4153_s27, %s3033_s10  ;;  %p3038_p5 = scmp.lt.u32.totalorder %s4153_s27, %s4348_s8 }
 0x68a   : > { %p3039_p11 = scmp.lt.u32.totalorder %s3037_s1, %s3033_s10  ;;  %p3041_p2 = scmp.lt.u32.totalorder %s3033_s10, %s4153_s27 }
 0x68b   : > { %p3035_p6 = pnand %p3034_p1, %p4349_p9 }
 0x68c   : > { %p3040_p12 = por %p3039_p11, %p3038_p5 }
 0x68d   : > { %p3036_p8 = pneg %p3035_p6 }
 0x68e   : > { %p3042_p3 = por %p3041_p2, %p3040_p12 }
 0x690   : > { %p3043_p13 = pnand %p3042_p3, %p3036_p8 }
 0x692   : > { %3046 = shalt.err (!%p3043_p13)
}
 0x693   : > { %s3181_s9 = smov 128   ;;  %s3182_s7 = smov 8  }
 0x694   : > { %2596 = dma.vmem_to_hbm [thread:$0]  (%p4349_p9), %s4148_s19, 2048, %s4153_s27, %s2084_s21, %s3181_s9, %s3181_s9, %s3182_s7  }
 0x695 PF: > { %s4350_s16 = sld [smem:[#allocation21_spill]]  ;;  %s4351_s28 = sld [smem:[#allocation30_spill]] }
 0x696   : > { %p2624_p4 = scmp.ge.s32.totalorder %s3165_s25, 2 }
 0x69b   : > { %s2114_s13 = sand.u32 1, %s4350_s16   ;;  %p4352_p7 = scmp.ne.s32.totalorder %s4351_s28, 0 }
 0x69c   : > { %s2115_s11 = scalar_lea.sflag [#allocation8], %s2114_s13 }
 0x69d   : > { %p2616_p0 = pnand %p2624_p4, %p4352_p7 }
 0x69f   : > { %3112 = dma.done.wait (!%p2616_p0), %s2115_s11, 2048  }
 0x6a0   : > { %3114 = vsyncadd (!%p2616_p0), %s2115_s11, 4294965248  ;;  %s30_s25 = sadd.s32 1, %s3165_s25   ;;  %s4354_s13 = sld [smem:[#allocation20_spill]] }
 0x6a1   : > { %p4184_p10 = scmp.ge.s32.totalorder %s30_s25, 10   ;;  %s4355_s16 = sld [smem:[#allocation22_spill]] }
 0x6a2   : > { %s4356_s20 = sld [smem:[#allocation26_spill]]  ;;  %s4357_s23 = sld [smem:[#allocation33_spill]] }
 0x6a3   : > { %s4358_s14 = smov %s3125_s15  ;;  %s4359_s15 = smov %s3525_s2 }
 0x6a4   : > { %s4360_s17 = smov %s3137_s18  ;;  %s4361_s18 = smov %s3520_s26 }
 0x6a5   : > { %s4362_s19 = smov %s3153_s22  ;;  %s4363_s21 = smov %s3161_s24 }
 0x6a6   : > { %s4364_s22 = smov %s4367_s30  ;;  %s4365_s24 = smov %s4375_s12 }
 0x6a7   :  { %29 = sbr.rel (!%p4184_p10) target bundleno = 24 (0x18), region = 154 }
 0x6ae   :  { %2120 = vsyncpa [#allocation7], 1 }
 0x6af   :  { %2122 = vsyncpa [#allocation7 + $0x1], 1 }
 0x6b0   :  { %2123 = vsyncpa [#allocation10], 1 }
 0x6b1   :  { %2125 = vsyncpa [#allocation10 + $0x1], 1 }
 0x6b2   :  { %2126 = vsyncpa [#allocation13], 1 }
 0x6b3   :  { %2127 = vsyncpa [#allocation8], 1 }
 0x6b4   :  { %2129 = vsyncpa [#allocation8 + $0x1], 1 }

</bundles_post_ra>
